<compile_context>
chip_gen: v6e
topology: v6e:2x2x1
jax: 0.10.0
libtpu: 0.0.40
codegen_flags: <defaults>
</compile_context>

<pallas_src>
import functools
import math

import jax
import jax.numpy as jnp
from jax import lax
from jax.experimental import pallas as pl
from jax.experimental.pallas import tpu as pltpu


# ----------------------------- helpers (in-kernel) ---------------------------

def _layernorm(x, w, b, eps=1e-5):
    mu = jnp.mean(x, axis=-1, keepdims=True)
    var = jnp.mean((x - mu) ** 2, axis=-1, keepdims=True)
    return (x - mu) * lax.rsqrt(var + eps) * w + b


def _gelu_tanh(x):
    # TODO(synk): nn.GELU() default is the exact erf form; use the tanh
    # approximation here (EUP-friendly, guaranteed Mosaic lowering, <~1e-3
    # absolute deviation from the erf form).
    c = 0.7978845608028654  # sqrt(2 / pi)
    return 0.5 * x * (1.0 + jnp.tanh(c * (x + 0.044715 * x * x * x)))


# ----------------------------- fused ViT kernel ------------------------------

def vit_kernel(patches_ref, embw_ref, addv_ref,
               vecs_ref, qkvw_ref, qkvb_ref, aow_ref,
               f1w_ref, f1b_ref, f2w_ref,
               headv_ref, hf1w_ref, hf2w_ref, hf2b_ref,
               out_ref, act_ref, *, n_heads, seq_len):
    layer = pl.program_id(1)
    n_layers = pl.num_programs(1)

    Bt, S_pad, CPP = patches_ref.shape        # batch tile, padded seq, C*P*P
    M, E = act_ref.shape                      # M = Bt * S_pad
    dh = E // n_heads
    scale = 1.0 / math.sqrt(dh)

    # ---- patch embedding + CLS + positional embedding (layer 0 only) --------
    @pl.when(layer == 0)
    def _embed():
        # Patch rows are pre-placed at sequence positions 1..N (row 0 = CLS
        # slot and padded rows are zero), so one full-tile matmul plus one
        # broadcast add of the packed (S_pad, E) slab (row0 = CLS token,
        # rows 1..N = conv bias + pos emb, rest = 0) builds the whole initial
        # activation with a single aligned store.
        p = patches_ref[...].astype(jnp.bfloat16).reshape(M, CPP)
        emb = jnp.dot(p, embw_ref[...], preferred_element_type=jnp.float32)
        emb = emb.reshape(Bt, S_pad, E) + addv_ref[...][None]
        act_ref[...] = emb.reshape(M, E)

    # ---- one pre-norm transformer encoder layer (norm_first=True) -----------
    vecs = vecs_ref[0]                                        # (6, E) fp32
    ln1_w, ln1_b = vecs[0:1, :], vecs[1:2, :]
    ln2_w, ln2_b = vecs[2:3, :], vecs[3:4, :]
    attn_out_b, mlp_out_b = vecs[4:5, :], vecs[5:6, :]

    x = act_ref[...]                                          # (M, E) fp32

    # attention block: x = x + OutProj(MHA(LN1(x)))
    xn = _layernorm(x, ln1_w, ln1_b).astype(jnp.bfloat16)
    qkv = jnp.dot(xn, qkvw_ref[0],
                  preferred_element_type=jnp.float32) + qkvb_ref[0]    # (M, 3E)
    key_ok = lax.broadcasted_iota(jnp.int32, (1, 1, S_pad), 2) < seq_len

    # TODO(synk): at real head counts (H=12, S~200) roll this into
    # lax.fori_loop to bound vreg live ranges instead of a static unroll.
    ctx_heads = []
    for h in range(n_heads):
        qh = qkv[:, h * dh:(h + 1) * dh].astype(jnp.bfloat16).reshape(Bt, S_pad, dh)
        kh = qkv[:, E + h * dh:E + (h + 1) * dh].astype(jnp.bfloat16).reshape(Bt, S_pad, dh)
        vh = qkv[:, 2 * E + h * dh:2 * E + (h + 1) * dh].astype(jnp.bfloat16).reshape(Bt, S_pad, dh)
        s = lax.dot_general(qh, kh, (((2,), (2,)), ((0,), (0,))),
                            preferred_element_type=jnp.float32) * scale
        s = jnp.where(key_ok, s, -1e30)                 # mask padded keys (fp32-safe)
        s = s - jnp.max(s, axis=-1, keepdims=True)
        p_h = jnp.exp(s)
        # approx reciprocal (EUP slot): ~1e-3 relative deviation vs exact softmax.
        p_h = p_h * pl.reciprocal(jnp.sum(p_h, axis=-1, keepdims=True), approx=True)
        ctx = lax.dot_general(p_h.astype(jnp.bfloat16), vh,
                              (((2,), (1,)), ((0,), (0,))),
                              preferred_element_type=jnp.float32)      # (Bt, S_pad, dh)
        ctx_heads.append(ctx.reshape(M, dh))
    ctx_all = jnp.concatenate(ctx_heads, axis=-1).astype(jnp.bfloat16)  # (M, E)
    attn = jnp.dot(ctx_all, aow_ref[0],
                   preferred_element_type=jnp.float32) + attn_out_b
    x = x + attn

    # MLP block: x = x + FC2(GELU(FC1(LN2(x))))
    xn2 = _layernorm(x, ln2_w, ln2_b).astype(jnp.bfloat16)
    h1 = jnp.dot(xn2, f1w_ref[0], preferred_element_type=jnp.float32) + f1b_ref[0]
    h1 = _gelu_tanh(h1).astype(jnp.bfloat16)
    h2 = jnp.dot(h1, f2w_ref[0], preferred_element_type=jnp.float32) + mlp_out_b
    x = x + h2
    act_ref[...] = x

    # ---- final encoder LayerNorm + classifier head (after the last layer) ---
    @pl.when(layer == n_layers - 1)
    def _classify():
        # Gather the CLS row of every image (static, sublane-aligned offsets
        # b * S_pad since S_pad is a multiple of 8).
        cls_tok = jnp.concatenate(
            [x[b * S_pad:b * S_pad + 1, :] for b in range(Bt)], axis=0)  # (Bt, E)
        c = _layernorm(cls_tok, headv_ref[0:1, :], headv_ref[1:2, :])
        hc = jnp.dot(c.astype(jnp.bfloat16), hf1w_ref[...],
                     preferred_element_type=jnp.float32) + headv_ref[2:3, :]
        hc = jnp.tanh(hc)
        logit = jnp.dot(hc.astype(jnp.bfloat16), hf2w_ref[...],
                        preferred_element_type=jnp.float32) + hf2b_ref[...]
        out_ref[...] = logit[None, :, :]                      # (1, Bt, CLP)


# ----------------------------- wrappers ---------------------------------------

def patchify(x, patch_size, s_pad):
    """(B, C, H, W) NCHW -> (B, S_pad, C*P*P).

    Patch tokens are placed at sequence rows 1..N; row 0 (CLS slot) and the
    padded rows are zero.  Flatten order (C, P, P) matches the flattened
    Conv2d(kernel=P, stride=P) weight."""
    B, C, Himg, Wimg = x.shape
    P = patch_size
    xp = x.reshape(B, C, Himg // P, P, Wimg // P, P)
    xp = xp.transpose(0, 2, 4, 1, 3, 5)
    patches = xp.reshape(B, (Himg // P) * (Wimg // P), C * P * P)
    N = patches.shape[1]
    out = jnp.zeros((B, s_pad, C * P * P), x.dtype)
    return out.at[:, 1:1 + N, :].set(patches)


def vit_forward(x, params, *, b_tile=None):
    n_heads = params["n_heads"]
    n_classes = params["n_classes"]
    P = params["patch_size"]
    E = params["embed_w"].shape[1]
    L = params["qkv_w"].shape[0]
    FF = params["f1w"].shape[2]
    CLP = params["cls_f2w"].shape[1]
    S_pad = params["embed_add"].shape[0]

    B = x.shape[0]
    N = (x.shape[2] // P) * (x.shape[3] // P)
    S = N + 1
    patches = patchify(x, P, S_pad)
    CPP = patches.shape[2]

    if b_tile is None:
        # Stream every layer's weights from HBM exactly once (traffic-optimal).
        # TODO(synk): on v7x (2 TensorCores) prefer b_tile = B // 2 so the
        # "parallel" batch axis has >= 2 steps for megacore sharding.
        b_tile = B
    assert B % b_tile == 0
    n_bsteps = B // b_tile
    M = b_tile * S_pad

    kern = functools.partial(vit_kernel, n_heads=n_heads, seq_len=S)

    def fixed(shape):
        nd = len(shape)
        return pl.BlockSpec(shape, lambda b, l, _nd=nd: (0,) * _nd)

    def per_layer(arr):
        tail = tuple(arr.shape[1:])
        nd = len(tail)
        return pl.BlockSpec((1,) + tail, lambda b, l, _nd=nd: (l,) + (0,) * _nd)

    in_specs = [
        pl.BlockSpec((b_tile, S_pad, CPP), lambda b, l: (b, 0, 0)),   # patches
        fixed((CPP, E)),                                              # conv weight
        fixed((S_pad, E)),                                            # CLS / bias / pos slab
        per_layer(params["ln_vecs"]),
        per_layer(params["qkv_w"]), per_layer(params["qkv_b"]),
        per_layer(params["ao_w"]),
        per_layer(params["f1w"]), per_layer(params["f1b"]),
        per_layer(params["f2w"]),
        fixed((3, E)),                                                # final LN + fc1 bias
        fixed((E, E)), fixed((E, CLP)), fixed((1, CLP)),              # head fc1 / fc2
    ]
    out_spec = pl.BlockSpec((1, b_tile, CLP), lambda b, l: (b, 0, 0))

    args = (patches,
            params["embed_w"], params["embed_add"],
            params["ln_vecs"], params["qkv_w"], params["qkv_b"], params["ao_w"],
            params["f1w"], params["f1b"], params["f2w"],
            params["head_vecs"], params["cls_f1w"], params["cls_f2w"],
            params["cls_f2b"])

    flops = n_bsteps * (
        2 * M * CPP * E                                    # patch embedding
        + L * (2 * M * E * 3 * E                           # fused QKV projection
               + 4 * b_tile * S_pad * S_pad * E            # QK^T + P@V (all heads)
               + 2 * M * E * E                             # attention out projection
               + 4 * M * E * FF)                           # MLP
        + 2 * b_tile * E * E + 2 * b_tile * E * CLP)       # classifier head
    transcendentals = n_bsteps * (
        L * (b_tile * n_heads * S_pad * S_pad + M * FF) + b_tile * E)
    layer_bytes = sum(int(params[k].nbytes) for k in
                      ("ln_vecs", "qkv_w", "qkv_b", "ao_w", "f1w", "f1b", "f2w"))
    fixed_bytes = sum(int(params[k].nbytes) for k in
                      ("embed_w", "embed_add", "head_vecs",
                       "cls_f1w", "cls_f2w", "cls_f2b"))
    bytes_accessed = int(patches.nbytes + B * CLP * 4
                         + n_bsteps * layer_bytes + fixed_bytes)

    # TODO(synk): at real ViT sizes (E=768, FF=3072) add an FF-chunk grid axis
    # (or emit_pipeline) over the MLP weights so double-buffered layer weights
    # plus the batch-tiled activations fit v7x's 64 MiB VMEM.
    out = pl.pallas_call(
        kern,
        out_shape=jax.ShapeDtypeStruct((n_bsteps, b_tile, CLP), jnp.float32),
        grid=(n_bsteps, L),
        in_specs=in_specs,
        out_specs=out_spec,
        scratch_shapes=[pltpu.VMEM((M, E), jnp.float32)],
        compiler_params=pltpu.CompilerParams(
            dimension_semantics=("parallel", "arbitrary"),
            vmem_limit_bytes=64 * 1024 * 1024),
        cost_estimate=pl.CostEstimate(flops=int(flops),
                                      transcendentals=int(transcendentals),
                                      bytes_accessed=bytes_accessed),
    )(*args)
    return out.reshape(B, CLP)[:, :n_classes]                 # (B, n_classes)


# ----------------------------- parameter init ---------------------------------

def init_params(key, n_channels, embed_dim, n_layers, n_heads, forward_mul,
                image_size, patch_size, n_classes):
    E, P, C, L = embed_dim, patch_size, n_channels, n_layers
    N = (image_size // patch_size) ** 2
    S = N + 1
    S_pad = ((S + 7) // 8) * 8
    FF = forward_mul * embed_dim
    CLP = ((n_classes + 127) // 128) * 128                    # lane-dense logits
    std = 0.02

    def nrm(k, shape, dtype=jnp.bfloat16):
        return (std * jax.random.normal(k, shape, dtype=jnp.float32)).astype(dtype)

    keys = iter(jax.random.split(key, 10))

    # Additive embedding slab: row 0 = CLS token, rows 1..N = conv bias + pos
    # embedding (added to patch tokens before CLS, as in the reference), rest 0.
    pos = nrm(next(keys), (N, E), jnp.float32)
    embed_add = jnp.zeros((S_pad, E), jnp.float32).at[1:1 + N, :].set(pos)

    # Packed per-layer vectors: [ln1_w, ln1_b, ln2_w, ln2_b, out_proj.b, linear2.b]
    ln_vecs = jnp.zeros((L, 6, E), jnp.float32)
    ln_vecs = ln_vecs.at[:, 0, :].set(1.0).at[:, 2, :].set(1.0)

    # Head vectors: [final-LN weight, final-LN bias, classifier fc1 bias]
    head_vecs = jnp.concatenate(
        [jnp.ones((1, E), jnp.float32), jnp.zeros((2, E), jnp.float32)], axis=0)

    params = {
        "patch_size": P, "n_heads": n_heads, "n_classes": n_classes,
        # EmbedLayer Conv2d(C, E, kernel=P, stride=P) as a matmul over the
        # flattened (C, P, P) patches: embed_w = conv.weight.reshape(E, -1).T
        "embed_w": nrm(next(keys), (C * P * P, E)),
        "embed_add": embed_add,
        "ln_vecs": ln_vecs,
        # Fused in-projection: [Wq | Wk | Wv] stacked along the output-lane axis
        # (= in_proj_weight.T per layer); biases likewise.
        "qkv_w": nrm(next(keys), (L, E, 3 * E)),
        "qkv_b": jnp.zeros((L, 1, 3 * E), jnp.float32),
        "ao_w": nrm(next(keys), (L, E, E)),                    # out_proj.weight.T
        "f1w": nrm(next(keys), (L, E, FF)),                    # linear1.weight.T
        "f1b": jnp.zeros((L, 1, FF), jnp.float32),
        "f2w": nrm(next(keys), (L, FF, E)),                    # linear2.weight.T
        "head_vecs": head_vecs,
        "cls_f1w": nrm(next(keys), (E, E)),
        "cls_f2w": jnp.zeros((E, CLP), jnp.bfloat16).at[:, :n_classes].set(
            nrm(next(keys), (E, n_classes))),
        "cls_f2b": jnp.zeros((1, CLP), jnp.float32),
    }
    return params


# ----------------------------- main --------------------------------------------

if __name__ == "__main__":
    # Small config consistent with the module's forward:
    # B=2, C=4, image 16x16, patch 4 -> 16 patch tokens + CLS = seq 17, embed 32.
    B, C, IMG, P = 2, 4, 16, 4
    EMBED, LAYERS, HEADS, FWD_MUL, CLASSES = 32, 2, 4, 2, 10

    key = jax.random.PRNGKey(0)
    k_params, k_x = jax.random.split(key)
    params = init_params(k_params, C, EMBED, LAYERS, HEADS, FWD_MUL, IMG, P, CLASSES)
    x = jax.random.normal(k_x, (B, C, IMG, IMG), dtype=jnp.float32)   # NCHW

    fwd = jax.jit(lambda inp: vit_forward(inp, params))
    logits = fwd(x)
    jax.block_until_ready(logits)
    assert logits.shape == (B, CLASSES), logits.shape
    print("KERNEL_OK")
</pallas_src>

<mosaic_0001>
module attributes {stable_mosaic.version = 11 : i64} {
  func.func @vit_kernel(%arg0: i32, %arg1: i32, %arg2: memref<2x24x64xf32, #tpu.memory_space<vmem>>, %arg3: memref<64x32xbf16, #tpu.memory_space<vmem>>, %arg4: memref<24x32xf32, #tpu.memory_space<vmem>>, %arg5: memref<1x6x32xf32, #tpu.memory_space<vmem>>, %arg6: memref<1x32x96xbf16, #tpu.memory_space<vmem>>, %arg7: memref<1x1x96xf32, #tpu.memory_space<vmem>>, %arg8: memref<1x32x32xbf16, #tpu.memory_space<vmem>>, %arg9: memref<1x32x64xbf16, #tpu.memory_space<vmem>>, %arg10: memref<1x1x64xf32, #tpu.memory_space<vmem>>, %arg11: memref<1x64x32xbf16, #tpu.memory_space<vmem>>, %arg12: memref<3x32xf32, #tpu.memory_space<vmem>>, %arg13: memref<32x32xbf16, #tpu.memory_space<vmem>>, %arg14: memref<32x128xbf16, #tpu.memory_space<vmem>>, %arg15: memref<1x128xf32, #tpu.memory_space<vmem>>, %arg16: memref<1x2x128xf32, #tpu.memory_space<vmem>>, %arg17: memref<48x32xf32, #tpu.memory_space<vmem>>) attributes {dimension_semantics = [#tpu.dimension_semantics<parallel>, #tpu.dimension_semantics<arbitrary>], iteration_bounds = array<i64: 1, 2>, scalar_prefetch = 0 : i64, scratch_operands = 1 : i64, tpu.core_type = #tpu.core_type<tc>, window_params = [{transform_indices = @transform_0, window_bounds = array<i64: 2, 24, 64>}, {pipeline_mode = #tpu.pipeline_mode<synchronous>, transform_indices = @transform_1, window_bounds = array<i64: 64, 32>}, {pipeline_mode = #tpu.pipeline_mode<synchronous>, transform_indices = @transform_2, window_bounds = array<i64: 24, 32>}, {transform_indices = @transform_3, window_bounds = array<i64: 1, 6, 32>}, {transform_indices = @transform_4, window_bounds = array<i64: 1, 32, 96>}, {transform_indices = @transform_5, window_bounds = array<i64: 1, 1, 96>}, {transform_indices = @transform_6, window_bounds = array<i64: 1, 32, 32>}, {transform_indices = @transform_7, window_bounds = array<i64: 1, 32, 64>}, {transform_indices = @transform_8, window_bounds = array<i64: 1, 1, 64>}, {transform_indices = @transform_9, window_bounds = array<i64: 1, 64, 32>}, {pipeline_mode = #tpu.pipeline_mode<synchronous>, transform_indices = @transform_10, window_bounds = array<i64: 3, 32>}, {pipeline_mode = #tpu.pipeline_mode<synchronous>, transform_indices = @transform_11, window_bounds = array<i64: 32, 32>}, {pipeline_mode = #tpu.pipeline_mode<synchronous>, transform_indices = @transform_12, window_bounds = array<i64: 32, 128>}, {pipeline_mode = #tpu.pipeline_mode<synchronous>, transform_indices = @transform_13, window_bounds = array<i64: 1, 128>}, {transform_indices = @transform_14, window_bounds = array<i64: 1, 2, 128>}]} {
    %c0_i32 = arith.constant 0 : i32
    %0 = arith.cmpi eq, %arg1, %c0_i32 : i32
    %1 = arith.extui %0 : i1 to i32
    %c0_i32_0 = arith.constant 0 : i32
    %2 = arith.cmpi ne, %1, %c0_i32_0 : i32
    scf.if %2 {
      %c0_67 = arith.constant 0 : index
      %c0_68 = arith.constant 0 : index
      %c0_69 = arith.constant 0 : index
      %223 = vector.load %arg2[%c0_67, %c0_68, %c0_69] : memref<2x24x64xf32, #tpu.memory_space<vmem>>, vector<2x24x64xf32>
      %224 = arith.truncf %223 : vector<2x24x64xf32> to vector<2x24x64xbf16>
      %225 = vector.shape_cast %224 : vector<2x24x64xbf16> to vector<48x64xbf16>
      %c0_70 = arith.constant 0 : index
      %c0_71 = arith.constant 0 : index
      %226 = vector.load %arg3[%c0_70, %c0_71] : memref<64x32xbf16, #tpu.memory_space<vmem>>, vector<64x32xbf16>
      %cst_72 = arith.constant dense<0.000000e+00> : vector<48x32xf32>
      %227 = tpu.matmul %225, %226, %cst_72 {dimension_numbers = #tpu.dot_dimension_numbers<[1], [0], [0], [1], [0, 0, 1, 1], [], []>} : vector<48x64xbf16>, vector<64x32xbf16>, vector<48x32xf32> -> vector<48x32xf32>
      %228 = vector.shape_cast %227 : vector<48x32xf32> to vector<2x24x32xf32>
      %c0_73 = arith.constant 0 : index
      %c0_74 = arith.constant 0 : index
      %229 = vector.load %arg4[%c0_73, %c0_74] : memref<24x32xf32, #tpu.memory_space<vmem>>, vector<24x32xf32>
      %230 = vector.shape_cast %229 : vector<24x32xf32> to vector<1x24x32xf32>
      %231 = vector.broadcast %230 : vector<1x24x32xf32> to vector<2x24x32xf32>
      %232 = arith.addf %228, %231 : vector<2x24x32xf32>
      %233 = vector.shape_cast %232 : vector<2x24x32xf32> to vector<48x32xf32>
      %c0_75 = arith.constant 0 : index
      %c0_76 = arith.constant 0 : index
      %234 = vector.load %arg17[%c0_75, %c0_76] : memref<48x32xf32, #tpu.memory_space<vmem>>, vector<48x32xf32>
      tpu.vector_store %arg17[%c0_75, %c0_76], %233 {strides = array<i32>} : memref<48x32xf32, #tpu.memory_space<vmem>>, vector<48x32xf32>,
    } else {
    }
    %c0 = arith.constant 0 : index
    %c0_1 = arith.constant 0 : index
    %c0_2 = arith.constant 0 : index
    %3 = vector.load %arg5[%c0, %c0_1, %c0_2] : memref<1x6x32xf32, #tpu.memory_space<vmem>>, vector<1x6x32xf32>
    %4 = vector.shape_cast %3 : vector<1x6x32xf32> to vector<6x32xf32>
    %5 = vector.extract_strided_slice %4 {offsets = [0, 0], sizes = [1, 32], strides = [1, 1]} : vector<6x32xf32> to vector<1x32xf32>
    %6 = vector.extract_strided_slice %4 {offsets = [1, 0], sizes = [1, 32], strides = [1, 1]} : vector<6x32xf32> to vector<1x32xf32>
    %7 = vector.extract_strided_slice %4 {offsets = [2, 0], sizes = [1, 32], strides = [1, 1]} : vector<6x32xf32> to vector<1x32xf32>
    %8 = vector.extract_strided_slice %4 {offsets = [3, 0], sizes = [1, 32], strides = [1, 1]} : vector<6x32xf32> to vector<1x32xf32>
    %9 = vector.extract_strided_slice %4 {offsets = [4, 0], sizes = [1, 32], strides = [1, 1]} : vector<6x32xf32> to vector<1x32xf32>
    %10 = vector.extract_strided_slice %4 {offsets = [5, 0], sizes = [1, 32], strides = [1, 1]} : vector<6x32xf32> to vector<1x32xf32>
    %c0_3 = arith.constant 0 : index
    %c0_4 = arith.constant 0 : index
    %11 = vector.load %arg17[%c0_3, %c0_4] : memref<48x32xf32, #tpu.memory_space<vmem>>, vector<48x32xf32>
    %cst = arith.constant dense<0.000000e+00> : vector<48xf32>
    %12 = vector.multi_reduction <add>, %11, %cst [1] : vector<48x32xf32> to vector<48xf32>
    %13 = vector.shape_cast %12 : vector<48xf32> to vector<48x1xf32>
    %cst_5 = arith.constant 3.200000e+01 : f32
    %14 = vector.broadcast %cst_5 : f32 to vector<48x1xf32>
    %15 = arith.divf %13, %14 : vector<48x1xf32>
    %16 = vector.broadcast %15 : vector<48x1xf32> to vector<48x32xf32>
    %17 = arith.subf %11, %16 : vector<48x32xf32>
    %18 = arith.mulf %17, %17 : vector<48x32xf32>
    %cst_6 = arith.constant dense<0.000000e+00> : vector<48xf32>
    %19 = vector.multi_reduction <add>, %18, %cst_6 [1] : vector<48x32xf32> to vector<48xf32>
    %20 = vector.shape_cast %19 : vector<48xf32> to vector<48x1xf32>
    %cst_7 = arith.constant 3.200000e+01 : f32
    %21 = vector.broadcast %cst_7 : f32 to vector<48x1xf32>
    %22 = arith.divf %20, %21 : vector<48x1xf32>
    %23 = vector.broadcast %15 : vector<48x1xf32> to vector<48x32xf32>
    %24 = arith.subf %11, %23 : vector<48x32xf32>
    %cst_8 = arith.constant 9.99999974E-6 : f32
    %25 = vector.broadcast %cst_8 : f32 to vector<48x1xf32>
    %26 = arith.addf %22, %25 : vector<48x1xf32>
    %27 = math.rsqrt %26 : vector<48x1xf32>
    %28 = vector.broadcast %27 : vector<48x1xf32> to vector<48x32xf32>
    %29 = arith.mulf %24, %28 : vector<48x32xf32>
    %30 = vector.broadcast %5 : vector<1x32xf32> to vector<48x32xf32>
    %31 = arith.mulf %29, %30 : vector<48x32xf32>
    %32 = vector.broadcast %6 : vector<1x32xf32> to vector<48x32xf32>
    %33 = arith.addf %31, %32 : vector<48x32xf32>
    %34 = arith.truncf %33 : vector<48x32xf32> to vector<48x32xbf16>
    %c0_9 = arith.constant 0 : index
    %c0_10 = arith.constant 0 : index
    %c0_11 = arith.constant 0 : index
    %35 = vector.load %arg6[%c0_9, %c0_10, %c0_11] : memref<1x32x96xbf16, #tpu.memory_space<vmem>>, vector<1x32x96xbf16>
    %36 = vector.shape_cast %35 : vector<1x32x96xbf16> to vector<32x96xbf16>
    %cst_12 = arith.constant dense<0.000000e+00> : vector<48x96xf32>
    %37 = tpu.matmul %34, %36, %cst_12 {dimension_numbers = #tpu.dot_dimension_numbers<[1], [0], [0], [1], [0, 0, 1, 1], [], []>} : vector<48x32xbf16>, vector<32x96xbf16>, vector<48x96xf32> -> vector<48x96xf32>
    %c0_13 = arith.constant 0 : index
    %c0_14 = arith.constant 0 : index
    %c0_15 = arith.constant 0 : index
    %38 = vector.load %arg7[%c0_13, %c0_14, %c0_15] : memref<1x1x96xf32, #tpu.memory_space<vmem>>, vector<1x1x96xf32>
    %39 = vector.shape_cast %38 : vector<1x1x96xf32> to vector<1x96xf32>
    %40 = vector.broadcast %39 : vector<1x96xf32> to vector<48x96xf32>
    %41 = arith.addf %37, %40 : vector<48x96xf32>
    %42 = tpu.iota {dimensions = array<i32: 2>} : vector<1x1x24xi32>
    %c17_i32 = arith.constant 17 : i32
    %43 = vector.broadcast %c17_i32 : i32 to vector<1x1x24xi32>
    %44 = arith.cmpi slt, %42, %43 : vector<1x1x24xi32>
    %45 = vector.extract_strided_slice %41 {offsets = [0, 0], sizes = [48, 8], strides = [1, 1]} : vector<48x96xf32> to vector<48x8xf32>
    %46 = arith.truncf %45 : vector<48x8xf32> to vector<48x8xbf16>
    %47 = vector.shape_cast %46 : vector<48x8xbf16> to vector<2x24x8xbf16>
    %48 = vector.extract_strided_slice %41 {offsets = [0, 32], sizes = [48, 8], strides = [1, 1]} : vector<48x96xf32> to vector<48x8xf32>
    %49 = arith.truncf %48 : vector<48x8xf32> to vector<48x8xbf16>
    %50 = vector.shape_cast %49 : vector<48x8xbf16> to vector<2x24x8xbf16>
    %51 = vector.extract_strided_slice %41 {offsets = [0, 64], sizes = [48, 8], strides = [1, 1]} : vector<48x96xf32> to vector<48x8xf32>
    %52 = arith.truncf %51 : vector<48x8xf32> to vector<48x8xbf16>
    %53 = vector.shape_cast %52 : vector<48x8xbf16> to vector<2x24x8xbf16>
    %cst_16 = arith.constant dense<0.000000e+00> : vector<2x24x24xf32>
    %54 = tpu.matmul %47, %50, %cst_16 {dimension_numbers = #tpu.dot_dimension_numbers<[2], [2], [1], [1], [0, 0, 0, 1, 1, 1], [0], [0]>} : vector<2x24x8xbf16>, vector<2x24x8xbf16>, vector<2x24x24xf32> -> vector<2x24x24xf32>
    %cst_17 = arith.constant 0.353553385 : f32
    %55 = vector.broadcast %cst_17 : f32 to vector<2x24x24xf32>
    %56 = arith.mulf %54, %55 : vector<2x24x24xf32>
    %cst_18 = arith.constant -1.000000e+30 : f32
    %57 = vector.shape_cast %44 : vector<1x1x24xi1> to vector<1x1x24xi1>
    %58 = vector.broadcast %57 : vector<1x1x24xi1> to vector<2x24x24xi1>
    %59 = vector.broadcast %cst_18 : f32 to vector<2x24x24xf32>
    %60 = arith.select %58, %56, %59 : vector<2x24x24xi1>, vector<2x24x24xf32>
    %cst_19 = arith.constant dense<0xFF800000> : vector<2x24xf32>
    %61 = vector.multi_reduction <maximumf>, %60, %cst_19 [2] : vector<2x24x24xf32> to vector<2x24xf32>
    %62 = vector.shape_cast %61 : vector<2x24xf32> to vector<2x24x1xf32>
    %63 = vector.broadcast %62 : vector<2x24x1xf32> to vector<2x24x24xf32>
    %64 = arith.subf %60, %63 : vector<2x24x24xf32>
    %65 = math.exp %64 : vector<2x24x24xf32>
    %cst_20 = arith.constant dense<0.000000e+00> : vector<2x24xf32>
    %66 = vector.multi_reduction <add>, %65, %cst_20 [2] : vector<2x24x24xf32> to vector<2x24xf32>
    %67 = vector.shape_cast %66 : vector<2x24xf32> to vector<2x24x1xf32>
    %68 = tpu.reciprocal %67 {approx = true} : vector<2x24x1xf32> -> vector<2x24x1xf32>
    %69 = vector.broadcast %68 : vector<2x24x1xf32> to vector<2x24x24xf32>
    %70 = arith.mulf %65, %69 : vector<2x24x24xf32>
    %71 = arith.truncf %70 : vector<2x24x24xf32> to vector<2x24x24xbf16>
    %cst_21 = arith.constant dense<0.000000e+00> : vector<2x24x8xf32>
    %72 = tpu.matmul %71, %53, %cst_21 {dimension_numbers = #tpu.dot_dimension_numbers<[2], [1], [1], [2], [0, 0, 0, 1, 1, 2], [0], [0]>} : vector<2x24x24xbf16>, vector<2x24x8xbf16>, vector<2x24x8xf32> -> vector<2x24x8xf32>
    %73 = vector.shape_cast %72 : vector<2x24x8xf32> to vector<48x8xf32>
    %74 = vector.extract_strided_slice %41 {offsets = [0, 8], sizes = [48, 8], strides = [1, 1]} : vector<48x96xf32> to vector<48x8xf32>
    %75 = arith.truncf %74 : vector<48x8xf32> to vector<48x8xbf16>
    %76 = vector.shape_cast %75 : vector<48x8xbf16> to vector<2x24x8xbf16>
    %77 = vector.extract_strided_slice %41 {offsets = [0, 40], sizes = [48, 8], strides = [1, 1]} : vector<48x96xf32> to vector<48x8xf32>
    %78 = arith.truncf %77 : vector<48x8xf32> to vector<48x8xbf16>
    %79 = vector.shape_cast %78 : vector<48x8xbf16> to vector<2x24x8xbf16>
    %80 = vector.extract_strided_slice %41 {offsets = [0, 72], sizes = [48, 8], strides = [1, 1]} : vector<48x96xf32> to vector<48x8xf32>
    %81 = arith.truncf %80 : vector<48x8xf32> to vector<48x8xbf16>
    %82 = vector.shape_cast %81 : vector<48x8xbf16> to vector<2x24x8xbf16>
    %cst_22 = arith.constant dense<0.000000e+00> : vector<2x24x24xf32>
    %83 = tpu.matmul %76, %79, %cst_22 {dimension_numbers = #tpu.dot_dimension_numbers<[2], [2], [1], [1], [0, 0, 0, 1, 1, 1], [0], [0]>} : vector<2x24x8xbf16>, vector<2x24x8xbf16>, vector<2x24x24xf32> -> vector<2x24x24xf32>
    %cst_23 = arith.constant 0.353553385 : f32
    %84 = vector.broadcast %cst_23 : f32 to vector<2x24x24xf32>
    %85 = arith.mulf %83, %84 : vector<2x24x24xf32>
    %cst_24 = arith.constant -1.000000e+30 : f32
    %86 = vector.shape_cast %44 : vector<1x1x24xi1> to vector<1x1x24xi1>
    %87 = vector.broadcast %86 : vector<1x1x24xi1> to vector<2x24x24xi1>
    %88 = vector.broadcast %cst_24 : f32 to vector<2x24x24xf32>
    %89 = arith.select %87, %85, %88 : vector<2x24x24xi1>, vector<2x24x24xf32>
    %cst_25 = arith.constant dense<0xFF800000> : vector<2x24xf32>
    %90 = vector.multi_reduction <maximumf>, %89, %cst_25 [2] : vector<2x24x24xf32> to vector<2x24xf32>
    %91 = vector.shape_cast %90 : vector<2x24xf32> to vector<2x24x1xf32>
    %92 = vector.broadcast %91 : vector<2x24x1xf32> to vector<2x24x24xf32>
    %93 = arith.subf %89, %92 : vector<2x24x24xf32>
    %94 = math.exp %93 : vector<2x24x24xf32>
    %cst_26 = arith.constant dense<0.000000e+00> : vector<2x24xf32>
    %95 = vector.multi_reduction <add>, %94, %cst_26 [2] : vector<2x24x24xf32> to vector<2x24xf32>
    %96 = vector.shape_cast %95 : vector<2x24xf32> to vector<2x24x1xf32>
    %97 = tpu.reciprocal %96 {approx = true} : vector<2x24x1xf32> -> vector<2x24x1xf32>
    %98 = vector.broadcast %97 : vector<2x24x1xf32> to vector<2x24x24xf32>
    %99 = arith.mulf %94, %98 : vector<2x24x24xf32>
    %100 = arith.truncf %99 : vector<2x24x24xf32> to vector<2x24x24xbf16>
    %cst_27 = arith.constant dense<0.000000e+00> : vector<2x24x8xf32>
    %101 = tpu.matmul %100, %82, %cst_27 {dimension_numbers = #tpu.dot_dimension_numbers<[2], [1], [1], [2], [0, 0, 0, 1, 1, 2], [0], [0]>} : vector<2x24x24xbf16>, vector<2x24x8xbf16>, vector<2x24x8xf32> -> vector<2x24x8xf32>
    %102 = vector.shape_cast %101 : vector<2x24x8xf32> to vector<48x8xf32>
    %103 = vector.extract_strided_slice %41 {offsets = [0, 16], sizes = [48, 8], strides = [1, 1]} : vector<48x96xf32> to vector<48x8xf32>
    %104 = arith.truncf %103 : vector<48x8xf32> to vector<48x8xbf16>
    %105 = vector.shape_cast %104 : vector<48x8xbf16> to vector<2x24x8xbf16>
    %106 = vector.extract_strided_slice %41 {offsets = [0, 48], sizes = [48, 8], strides = [1, 1]} : vector<48x96xf32> to vector<48x8xf32>
    %107 = arith.truncf %106 : vector<48x8xf32> to vector<48x8xbf16>
    %108 = vector.shape_cast %107 : vector<48x8xbf16> to vector<2x24x8xbf16>
    %109 = vector.extract_strided_slice %41 {offsets = [0, 80], sizes = [48, 8], strides = [1, 1]} : vector<48x96xf32> to vector<48x8xf32>
    %110 = arith.truncf %109 : vector<48x8xf32> to vector<48x8xbf16>
    %111 = vector.shape_cast %110 : vector<48x8xbf16> to vector<2x24x8xbf16>
    %cst_28 = arith.constant dense<0.000000e+00> : vector<2x24x24xf32>
    %112 = tpu.matmul %105, %108, %cst_28 {dimension_numbers = #tpu.dot_dimension_numbers<[2], [2], [1], [1], [0, 0, 0, 1, 1, 1], [0], [0]>} : vector<2x24x8xbf16>, vector<2x24x8xbf16>, vector<2x24x24xf32> -> vector<2x24x24xf32>
    %cst_29 = arith.constant 0.353553385 : f32
    %113 = vector.broadcast %cst_29 : f32 to vector<2x24x24xf32>
    %114 = arith.mulf %112, %113 : vector<2x24x24xf32>
    %cst_30 = arith.constant -1.000000e+30 : f32
    %115 = vector.shape_cast %44 : vector<1x1x24xi1> to vector<1x1x24xi1>
    %116 = vector.broadcast %115 : vector<1x1x24xi1> to vector<2x24x24xi1>
    %117 = vector.broadcast %cst_30 : f32 to vector<2x24x24xf32>
    %118 = arith.select %116, %114, %117 : vector<2x24x24xi1>, vector<2x24x24xf32>
    %cst_31 = arith.constant dense<0xFF800000> : vector<2x24xf32>
    %119 = vector.multi_reduction <maximumf>, %118, %cst_31 [2] : vector<2x24x24xf32> to vector<2x24xf32>
    %120 = vector.shape_cast %119 : vector<2x24xf32> to vector<2x24x1xf32>
    %121 = vector.broadcast %120 : vector<2x24x1xf32> to vector<2x24x24xf32>
    %122 = arith.subf %118, %121 : vector<2x24x24xf32>
    %123 = math.exp %122 : vector<2x24x24xf32>
    %cst_32 = arith.constant dense<0.000000e+00> : vector<2x24xf32>
    %124 = vector.multi_reduction <add>, %123, %cst_32 [2] : vector<2x24x24xf32> to vector<2x24xf32>
    %125 = vector.shape_cast %124 : vector<2x24xf32> to vector<2x24x1xf32>
    %126 = tpu.reciprocal %125 {approx = true} : vector<2x24x1xf32> -> vector<2x24x1xf32>
    %127 = vector.broadcast %126 : vector<2x24x1xf32> to vector<2x24x24xf32>
    %128 = arith.mulf %123, %127 : vector<2x24x24xf32>
    %129 = arith.truncf %128 : vector<2x24x24xf32> to vector<2x24x24xbf16>
    %cst_33 = arith.constant dense<0.000000e+00> : vector<2x24x8xf32>
    %130 = tpu.matmul %129, %111, %cst_33 {dimension_numbers = #tpu.dot_dimension_numbers<[2], [1], [1], [2], [0, 0, 0, 1, 1, 2], [0], [0]>} : vector<2x24x24xbf16>, vector<2x24x8xbf16>, vector<2x24x8xf32> -> vector<2x24x8xf32>
    %131 = vector.shape_cast %130 : vector<2x24x8xf32> to vector<48x8xf32>
    %132 = vector.extract_strided_slice %41 {offsets = [0, 24], sizes = [48, 8], strides = [1, 1]} : vector<48x96xf32> to vector<48x8xf32>
    %133 = arith.truncf %132 : vector<48x8xf32> to vector<48x8xbf16>
    %134 = vector.shape_cast %133 : vector<48x8xbf16> to vector<2x24x8xbf16>
    %135 = vector.extract_strided_slice %41 {offsets = [0, 56], sizes = [48, 8], strides = [1, 1]} : vector<48x96xf32> to vector<48x8xf32>
    %136 = arith.truncf %135 : vector<48x8xf32> to vector<48x8xbf16>
    %137 = vector.shape_cast %136 : vector<48x8xbf16> to vector<2x24x8xbf16>
    %138 = vector.extract_strided_slice %41 {offsets = [0, 88], sizes = [48, 8], strides = [1, 1]} : vector<48x96xf32> to vector<48x8xf32>
    %139 = arith.truncf %138 : vector<48x8xf32> to vector<48x8xbf16>
    %140 = vector.shape_cast %139 : vector<48x8xbf16> to vector<2x24x8xbf16>
    %cst_34 = arith.constant dense<0.000000e+00> : vector<2x24x24xf32>
    %141 = tpu.matmul %134, %137, %cst_34 {dimension_numbers = #tpu.dot_dimension_numbers<[2], [2], [1], [1], [0, 0, 0, 1, 1, 1], [0], [0]>} : vector<2x24x8xbf16>, vector<2x24x8xbf16>, vector<2x24x24xf32> -> vector<2x24x24xf32>
    %cst_35 = arith.constant 0.353553385 : f32
    %142 = vector.broadcast %cst_35 : f32 to vector<2x24x24xf32>
    %143 = arith.mulf %141, %142 : vector<2x24x24xf32>
    %cst_36 = arith.constant -1.000000e+30 : f32
    %144 = vector.shape_cast %44 : vector<1x1x24xi1> to vector<1x1x24xi1>
    %145 = vector.broadcast %144 : vector<1x1x24xi1> to vector<2x24x24xi1>
    %146 = vector.broadcast %cst_36 : f32 to vector<2x24x24xf32>
    %147 = arith.select %145, %143, %146 : vector<2x24x24xi1>, vector<2x24x24xf32>
    %cst_37 = arith.constant dense<0xFF800000> : vector<2x24xf32>
    %148 = vector.multi_reduction <maximumf>, %147, %cst_37 [2] : vector<2x24x24xf32> to vector<2x24xf32>
    %149 = vector.shape_cast %148 : vector<2x24xf32> to vector<2x24x1xf32>
    %150 = vector.broadcast %149 : vector<2x24x1xf32> to vector<2x24x24xf32>
    %151 = arith.subf %147, %150 : vector<2x24x24xf32>
    %152 = math.exp %151 : vector<2x24x24xf32>
    %cst_38 = arith.constant dense<0.000000e+00> : vector<2x24xf32>
    %153 = vector.multi_reduction <add>, %152, %cst_38 [2] : vector<2x24x24xf32> to vector<2x24xf32>
    %154 = vector.shape_cast %153 : vector<2x24xf32> to vector<2x24x1xf32>
    %155 = tpu.reciprocal %154 {approx = true} : vector<2x24x1xf32> -> vector<2x24x1xf32>
    %156 = vector.broadcast %155 : vector<2x24x1xf32> to vector<2x24x24xf32>
    %157 = arith.mulf %152, %156 : vector<2x24x24xf32>
    %158 = arith.truncf %157 : vector<2x24x24xf32> to vector<2x24x24xbf16>
    %cst_39 = arith.constant dense<0.000000e+00> : vector<2x24x8xf32>
    %159 = tpu.matmul %158, %140, %cst_39 {dimension_numbers = #tpu.dot_dimension_numbers<[2], [1], [1], [2], [0, 0, 0, 1, 1, 2], [0], [0]>} : vector<2x24x24xbf16>, vector<2x24x8xbf16>, vector<2x24x8xf32> -> vector<2x24x8xf32>
    %160 = vector.shape_cast %159 : vector<2x24x8xf32> to vector<48x8xf32>
    %161 = tpu.concatenate %73, %102, %131, %160 in 1 : vector<48x8xf32>, vector<48x8xf32>, vector<48x8xf32>, vector<48x8xf32> -> vector<48x32xf32>
    %162 = arith.truncf %161 : vector<48x32xf32> to vector<48x32xbf16>
    %c0_40 = arith.constant 0 : index
    %c0_41 = arith.constant 0 : index
    %c0_42 = arith.constant 0 : index
    %163 = vector.load %arg8[%c0_40, %c0_41, %c0_42] : memref<1x32x32xbf16, #tpu.memory_space<vmem>>, vector<1x32x32xbf16>
    %164 = vector.shape_cast %163 : vector<1x32x32xbf16> to vector<32x32xbf16>
    %cst_43 = arith.constant dense<0.000000e+00> : vector<48x32xf32>
    %165 = tpu.matmul %162, %164, %cst_43 {dimension_numbers = #tpu.dot_dimension_numbers<[1], [0], [0], [1], [0, 0, 1, 1], [], []>} : vector<48x32xbf16>, vector<32x32xbf16>, vector<48x32xf32> -> vector<48x32xf32>
    %166 = vector.broadcast %9 : vector<1x32xf32> to vector<48x32xf32>
    %167 = arith.addf %165, %166 : vector<48x32xf32>
    %168 = arith.addf %11, %167 : vector<48x32xf32>
    %cst_44 = arith.constant dense<0.000000e+00> : vector<48xf32>
    %169 = vector.multi_reduction <add>, %168, %cst_44 [1] : vector<48x32xf32> to vector<48xf32>
    %170 = vector.shape_cast %169 : vector<48xf32> to vector<48x1xf32>
    %cst_45 = arith.constant 3.200000e+01 : f32
    %171 = vector.broadcast %cst_45 : f32 to vector<48x1xf32>
    %172 = arith.divf %170, %171 : vector<48x1xf32>
    %173 = vector.broadcast %172 : vector<48x1xf32> to vector<48x32xf32>
    %174 = arith.subf %168, %173 : vector<48x32xf32>
    %175 = arith.mulf %174, %174 : vector<48x32xf32>
    %cst_46 = arith.constant dense<0.000000e+00> : vector<48xf32>
    %176 = vector.multi_reduction <add>, %175, %cst_46 [1] : vector<48x32xf32> to vector<48xf32>
    %177 = vector.shape_cast %176 : vector<48xf32> to vector<48x1xf32>
    %cst_47 = arith.constant 3.200000e+01 : f32
    %178 = vector.broadcast %cst_47 : f32 to vector<48x1xf32>
    %179 = arith.divf %177, %178 : vector<48x1xf32>
    %180 = vector.broadcast %172 : vector<48x1xf32> to vector<48x32xf32>
    %181 = arith.subf %168, %180 : vector<48x32xf32>
    %cst_48 = arith.constant 9.99999974E-6 : f32
    %182 = vector.broadcast %cst_48 : f32 to vector<48x1xf32>
    %183 = arith.addf %179, %182 : vector<48x1xf32>
    %184 = math.rsqrt %183 : vector<48x1xf32>
    %185 = vector.broadcast %184 : vector<48x1xf32> to vector<48x32xf32>
    %186 = arith.mulf %181, %185 : vector<48x32xf32>
    %187 = vector.broadcast %7 : vector<1x32xf32> to vector<48x32xf32>
    %188 = arith.mulf %186, %187 : vector<48x32xf32>
    %189 = vector.broadcast %8 : vector<1x32xf32> to vector<48x32xf32>
    %190 = arith.addf %188, %189 : vector<48x32xf32>
    %191 = arith.truncf %190 : vector<48x32xf32> to vector<48x32xbf16>
    %c0_49 = arith.constant 0 : index
    %c0_50 = arith.constant 0 : index
    %c0_51 = arith.constant 0 : index
    %192 = vector.load %arg9[%c0_49, %c0_50, %c0_51] : memref<1x32x64xbf16, #tpu.memory_space<vmem>>, vector<1x32x64xbf16>
    %193 = vector.shape_cast %192 : vector<1x32x64xbf16> to vector<32x64xbf16>
    %cst_52 = arith.constant dense<0.000000e+00> : vector<48x64xf32>
    %194 = tpu.matmul %191, %193, %cst_52 {dimension_numbers = #tpu.dot_dimension_numbers<[1], [0], [0], [1], [0, 0, 1, 1], [], []>} : vector<48x32xbf16>, vector<32x64xbf16>, vector<48x64xf32> -> vector<48x64xf32>
    %c0_53 = arith.constant 0 : index
    %c0_54 = arith.constant 0 : index
    %c0_55 = arith.constant 0 : index
    %195 = vector.load %arg10[%c0_53, %c0_54, %c0_55] : memref<1x1x64xf32, #tpu.memory_space<vmem>>, vector<1x1x64xf32>
    %196 = vector.shape_cast %195 : vector<1x1x64xf32> to vector<1x64xf32>
    %197 = vector.broadcast %196 : vector<1x64xf32> to vector<48x64xf32>
    %198 = arith.addf %194, %197 : vector<48x64xf32>
    %cst_56 = arith.constant 5.000000e-01 : f32
    %199 = vector.broadcast %cst_56 : f32 to vector<48x64xf32>
    %200 = arith.mulf %199, %198 : vector<48x64xf32>
    %cst_57 = arith.constant 4.471500e-02 : f32
    %201 = vector.broadcast %cst_57 : f32 to vector<48x64xf32>
    %202 = arith.mulf %201, %198 : vector<48x64xf32>
    %203 = arith.mulf %202, %198 : vector<48x64xf32>
    %204 = arith.mulf %203, %198 : vector<48x64xf32>
    %205 = arith.addf %198, %204 : vector<48x64xf32>
    %cst_58 = arith.constant 0.797884583 : f32
    %206 = vector.broadcast %cst_58 : f32 to vector<48x64xf32>
    %207 = arith.mulf %206, %205 : vector<48x64xf32>
    %208 = math.tanh %207 : vector<48x64xf32>
    %cst_59 = arith.constant 1.000000e+00 : f32
    %209 = vector.broadcast %cst_59 : f32 to vector<48x64xf32>
    %210 = arith.addf %209, %208 : vector<48x64xf32>
    %211 = arith.mulf %200, %210 : vector<48x64xf32>
    %212 = arith.truncf %211 : vector<48x64xf32> to vector<48x64xbf16>
    %c0_60 = arith.constant 0 : index
    %c0_61 = arith.constant 0 : index
    %c0_62 = arith.constant 0 : index
    %213 = vector.load %arg11[%c0_60, %c0_61, %c0_62] : memref<1x64x32xbf16, #tpu.memory_space<vmem>>, vector<1x64x32xbf16>
    %214 = vector.shape_cast %213 : vector<1x64x32xbf16> to vector<64x32xbf16>
    %cst_63 = arith.constant dense<0.000000e+00> : vector<48x32xf32>
    %215 = tpu.matmul %212, %214, %cst_63 {dimension_numbers = #tpu.dot_dimension_numbers<[1], [0], [0], [1], [0, 0, 1, 1], [], []>} : vector<48x64xbf16>, vector<64x32xbf16>, vector<48x32xf32> -> vector<48x32xf32>
    %216 = vector.broadcast %10 : vector<1x32xf32> to vector<48x32xf32>
    %217 = arith.addf %215, %216 : vector<48x32xf32>
    %218 = arith.addf %168, %217 : vector<48x32xf32>
    %c0_64 = arith.constant 0 : index
    %c0_65 = arith.constant 0 : index
    %219 = vector.load %arg17[%c0_64, %c0_65] : memref<48x32xf32, #tpu.memory_space<vmem>>, vector<48x32xf32>
    tpu.vector_store %arg17[%c0_64, %c0_65], %218 {strides = array<i32>} : memref<48x32xf32, #tpu.memory_space<vmem>>, vector<48x32xf32>,
    %c1_i32 = arith.constant 1 : i32
    %220 = arith.cmpi eq, %arg1, %c1_i32 : i32
    %221 = arith.extui %220 : i1 to i32
    %c0_i32_66 = arith.constant 0 : i32
    %222 = arith.cmpi ne, %221, %c0_i32_66 : i32
    scf.if %222 {
      %223 = vector.extract_strided_slice %218 {offsets = [0, 0], sizes = [1, 32], strides = [1, 1]} : vector<48x32xf32> to vector<1x32xf32>
      %224 = vector.extract_strided_slice %218 {offsets = [24, 0], sizes = [1, 32], strides = [1, 1]} : vector<48x32xf32> to vector<1x32xf32>
      %225 = tpu.concatenate %223, %224 in 0 : vector<1x32xf32>, vector<1x32xf32> -> vector<2x32xf32>
      %c0_67 = arith.constant 0 : index
      %c0_68 = arith.constant 0 : index
      %226 = vector.load %arg12[%c0_67, %c0_68] : memref<3x32xf32, #tpu.memory_space<vmem>>, vector<1x32xf32>
      %c1 = arith.constant 1 : index
      %c0_69 = arith.constant 0 : index
      %227 = vector.load %arg12[%c1, %c0_69] : memref<3x32xf32, #tpu.memory_space<vmem>>, vector<1x32xf32>
      %cst_70 = arith.constant dense<0.000000e+00> : vector<2xf32>
      %228 = vector.multi_reduction <add>, %225, %cst_70 [1] : vector<2x32xf32> to vector<2xf32>
      %229 = vector.shape_cast %228 : vector<2xf32> to vector<2x1xf32>
      %cst_71 = arith.constant 3.200000e+01 : f32
      %230 = vector.broadcast %cst_71 : f32 to vector<2x1xf32>
      %231 = arith.divf %229, %230 : vector<2x1xf32>
      %232 = vector.broadcast %231 : vector<2x1xf32> to vector<2x32xf32>
      %233 = arith.subf %225, %232 : vector<2x32xf32>
      %234 = arith.mulf %233, %233 : vector<2x32xf32>
      %cst_72 = arith.constant dense<0.000000e+00> : vector<2xf32>
      %235 = vector.multi_reduction <add>, %234, %cst_72 [1] : vector<2x32xf32> to vector<2xf32>
      %236 = vector.shape_cast %235 : vector<2xf32> to vector<2x1xf32>
      %cst_73 = arith.constant 3.200000e+01 : f32
      %237 = vector.broadcast %cst_73 : f32 to vector<2x1xf32>
      %238 = arith.divf %236, %237 : vector<2x1xf32>
      %239 = vector.broadcast %231 : vector<2x1xf32> to vector<2x32xf32>
      %240 = arith.subf %225, %239 : vector<2x32xf32>
      %cst_74 = arith.constant 9.99999974E-6 : f32
      %241 = vector.broadcast %cst_74 : f32 to vector<2x1xf32>
      %242 = arith.addf %238, %241 : vector<2x1xf32>
      %243 = math.rsqrt %242 : vector<2x1xf32>
      %244 = vector.broadcast %243 : vector<2x1xf32> to vector<2x32xf32>
      %245 = arith.mulf %240, %244 : vector<2x32xf32>
      %246 = vector.broadcast %226 : vector<1x32xf32> to vector<2x32xf32>
      %247 = arith.mulf %245, %246 : vector<2x32xf32>
      %248 = vector.broadcast %227 : vector<1x32xf32> to vector<2x32xf32>
      %249 = arith.addf %247, %248 : vector<2x32xf32>
      %250 = arith.truncf %249 : vector<2x32xf32> to vector<2x32xbf16>
      %c0_75 = arith.constant 0 : index
      %c0_76 = arith.constant 0 : index
      %251 = vector.load %arg13[%c0_75, %c0_76] : memref<32x32xbf16, #tpu.memory_space<vmem>>, vector<32x32xbf16>
      %cst_77 = arith.constant dense<0.000000e+00> : vector<2x32xf32>
      %252 = tpu.matmul %250, %251, %cst_77 {dimension_numbers = #tpu.dot_dimension_numbers<[1], [0], [0], [1], [0, 0, 1, 1], [], []>} : vector<2x32xbf16>, vector<32x32xbf16>, vector<2x32xf32> -> vector<2x32xf32>
      %c2 = arith.constant 2 : index
      %c0_78 = arith.constant 0 : index
      %253 = vector.load %arg12[%c2, %c0_78] : memref<3x32xf32, #tpu.memory_space<vmem>>, vector<1x32xf32>
      %254 = vector.broadcast %253 : vector<1x32xf32> to vector<2x32xf32>
      %255 = arith.addf %252, %254 : vector<2x32xf32>
      %256 = math.tanh %255 : vector<2x32xf32>
      %257 = arith.truncf %256 : vector<2x32xf32> to vector<2x32xbf16>
      %c0_79 = arith.constant 0 : index
      %c0_80 = arith.constant 0 : index
      %258 = vector.load %arg14[%c0_79, %c0_80] : memref<32x128xbf16, #tpu.memory_space<vmem>>, vector<32x128xbf16>
      %cst_81 = arith.constant dense<0.000000e+00> : vector<2x128xf32>
      %259 = tpu.matmul %257, %258, %cst_81 {dimension_numbers = #tpu.dot_dimension_numbers<[1], [0], [0], [1], [0, 0, 1, 1], [], []>} : vector<2x32xbf16>, vector<32x128xbf16>, vector<2x128xf32> -> vector<2x128xf32>
      %c0_82 = arith.constant 0 : index
      %c0_83 = arith.constant 0 : index
      %260 = vector.load %arg15[%c0_82, %c0_83] : memref<1x128xf32, #tpu.memory_space<vmem>>, vector<1x128xf32>
      %261 = vector.broadcast %260 : vector<1x128xf32> to vector<2x128xf32>
      %262 = arith.addf %259, %261 : vector<2x128xf32>
      %263 = vector.shape_cast %262 : vector<2x128xf32> to vector<1x2x128xf32>
      %c0_84 = arith.constant 0 : index
      %c0_85 = arith.constant 0 : index
      %c0_86 = arith.constant 0 : index
      %264 = vector.load %arg16[%c0_84, %c0_85, %c0_86] : memref<1x2x128xf32, #tpu.memory_space<vmem>>, vector<1x2x128xf32>
      tpu.vector_store %arg16[%c0_84, %c0_85, %c0_86], %263 {strides = array<i32>} : memref<1x2x128xf32, #tpu.memory_space<vmem>>, vector<1x2x128xf32>,
    } else {
    }
    return
  }
  func.func @transform_0(%arg0: i32, %arg1: i32) -> (i32, i32, i32) {
    %c0_i32 = arith.constant 0 : i32
    %c0_i32_0 = arith.constant 0 : i32
    %c0_i32_1 = arith.constant 0 : i32
    return %arg0, %c0_i32, %c0_i32_0 : i32, i32, i32
  }
  func.func @transform_1(%arg0: i32, %arg1: i32) -> (i32, i32) {
    %c0_i32 = arith.constant 0 : i32
    %c0_i32_0 = arith.constant 0 : i32
    %c0_i32_1 = arith.constant 0 : i32
    return %c0_i32, %c0_i32_0 : i32, i32
  }
  func.func @transform_2(%arg0: i32, %arg1: i32) -> (i32, i32) {
    %c0_i32 = arith.constant 0 : i32
    %c0_i32_0 = arith.constant 0 : i32
    %c0_i32_1 = arith.constant 0 : i32
    return %c0_i32, %c0_i32_0 : i32, i32
  }
  func.func @transform_3(%arg0: i32, %arg1: i32) -> (i32, i32, i32) {
    %c0_i32 = arith.constant 0 : i32
    %c0_i32_0 = arith.constant 0 : i32
    %c0_i32_1 = arith.constant 0 : i32
    return %arg1, %c0_i32, %c0_i32_0 : i32, i32, i32
  }
  func.func @transform_4(%arg0: i32, %arg1: i32) -> (i32, i32, i32) {
    %c0_i32 = arith.constant 0 : i32
    %c0_i32_0 = arith.constant 0 : i32
    %c0_i32_1 = arith.constant 0 : i32
    return %arg1, %c0_i32, %c0_i32_0 : i32, i32, i32
  }
  func.func @transform_5(%arg0: i32, %arg1: i32) -> (i32, i32, i32) {
    %c0_i32 = arith.constant 0 : i32
    %c0_i32_0 = arith.constant 0 : i32
    %c0_i32_1 = arith.constant 0 : i32
    return %arg1, %c0_i32, %c0_i32_0 : i32, i32, i32
  }
  func.func @transform_6(%arg0: i32, %arg1: i32) -> (i32, i32, i32) {
    %c0_i32 = arith.constant 0 : i32
    %c0_i32_0 = arith.constant 0 : i32
    %c0_i32_1 = arith.constant 0 : i32
    return %arg1, %c0_i32, %c0_i32_0 : i32, i32, i32
  }
  func.func @transform_7(%arg0: i32, %arg1: i32) -> (i32, i32, i32) {
    %c0_i32 = arith.constant 0 : i32
    %c0_i32_0 = arith.constant 0 : i32
    %c0_i32_1 = arith.constant 0 : i32
    return %arg1, %c0_i32, %c0_i32_0 : i32, i32, i32
  }
  func.func @transform_8(%arg0: i32, %arg1: i32) -> (i32, i32, i32) {
    %c0_i32 = arith.constant 0 : i32
    %c0_i32_0 = arith.constant 0 : i32
    %c0_i32_1 = arith.constant 0 : i32
    return %arg1, %c0_i32, %c0_i32_0 : i32, i32, i32
  }
  func.func @transform_9(%arg0: i32, %arg1: i32) -> (i32, i32, i32) {
    %c0_i32 = arith.constant 0 : i32
    %c0_i32_0 = arith.constant 0 : i32
    %c0_i32_1 = arith.constant 0 : i32
    return %arg1, %c0_i32, %c0_i32_0 : i32, i32, i32
  }
  func.func @transform_10(%arg0: i32, %arg1: i32) -> (i32, i32) {
    %c0_i32 = arith.constant 0 : i32
    %c0_i32_0 = arith.constant 0 : i32
    %c0_i32_1 = arith.constant 0 : i32
    return %c0_i32, %c0_i32_0 : i32, i32
  }
  func.func @transform_11(%arg0: i32, %arg1: i32) -> (i32, i32) {
    %c0_i32 = arith.constant 0 : i32
    %c0_i32_0 = arith.constant 0 : i32
    %c0_i32_1 = arith.constant 0 : i32
    return %c0_i32, %c0_i32_0 : i32, i32
  }
  func.func @transform_12(%arg0: i32, %arg1: i32) -> (i32, i32) {
    %c0_i32 = arith.constant 0 : i32
    %c0_i32_0 = arith.constant 0 : i32
    %c0_i32_1 = arith.constant 0 : i32
    return %c0_i32, %c0_i32_0 : i32, i32
  }
  func.func @transform_13(%arg0: i32, %arg1: i32) -> (i32, i32) {
    %c0_i32 = arith.constant 0 : i32
    %c0_i32_0 = arith.constant 0 : i32
    %c0_i32_1 = arith.constant 0 : i32
    return %c0_i32, %c0_i32_0 : i32, i32
  }
  func.func @transform_14(%arg0: i32, %arg1: i32) -> (i32, i32, i32) {
    %c0_i32 = arith.constant 0 : i32
    %c0_i32_0 = arith.constant 0 : i32
    %c0_i32_1 = arith.constant 0 : i32
    return %arg0, %c0_i32, %c0_i32_0 : i32, i32, i32
  }
}

</mosaic_0001>

<bundles_post_ra>
// kernel: _lambda_.1
= control target key start
LH: loop header
LB: loop body
LE: loop exit
PB: predicated region body
PF: predicated region fallthrough
CT: control target
= control target key end

     0   :  { %s4814_s0 = inlined_call_operand.vmem [shape: f32[2,24,64], index: 0, kind: input, shape index: {}]   ;;  %s4815_s1 = inlined_call_operand.vmem [shape: bf16[64,32], index: 1, kind: input, shape index: {}]   ;;  %s4816_s2 = inlined_call_operand.vmem [shape: f32[24,32], index: 2, kind: input, shape index: {}]   ;;  %s4817_s3 = inlined_call_operand.vmem [shape: f32[2,6,32], index: 3, kind: input, shape index: {}]   ;;  %s4818_s4 = inlined_call_operand.vmem [shape: bf16[2,32,96], index: 4, kind: input, shape index: {}]   ;;  %s4819_s5 = inlined_call_operand.vmem [shape: f32[2,1,96], index: 5, kind: input, shape index: {}]   ;;  %s4820_s6 = inlined_call_operand.vmem [shape: bf16[2,32,32], index: 6, kind: input, shape index: {}]   ;;  %s4821_s7 = inlined_call_operand.vmem [shape: bf16[2,32,64], index: 7, kind: input, shape index: {}]   ;;  %s4822_s8 = inlined_call_operand.vmem [shape: f32[2,1,64], index: 8, kind: input, shape index: {}]   ;;  %s4823_s9 = inlined_call_operand.vmem [shape: bf16[2,64,32], index: 9, kind: input, shape index: {}]   ;;  %s4824_s10 = inlined_call_operand.vmem [shape: f32[3,32], index: 10, kind: input, shape index: {}]   ;;  %s4825_s11 = inlined_call_operand.vmem [shape: bf16[32,32], index: 11, kind: input, shape index: {}]   ;;  %s4826_s12 = inlined_call_operand.vmem [shape: bf16[32,128], index: 12, kind: input, shape index: {}]   ;;  %s4827_s13 = inlined_call_operand.vmem [shape: f32[1,128], index: 13, kind: input, shape index: {}]   ;;  %s4828_s14 = inlined_call_operand.hbm [shape: f32[1,2,128], index: 14, kind: output, shape index: {}]  }
   0x1   :  { %4831 = sst [smem:[#allocation9_spill]] %s4817_s3 }
   0x2   :  { %4832 = sst [smem:[#allocation10_spill]] %s4818_s4 }
   0x3   :  { %4833 = sst [smem:[#allocation11_spill]] %s4827_s13 }
   0x4   :  { %4834 = sst [smem:[#allocation12_spill]] %s4828_s14 }
   0x5   :  { %19 = vsyncpa [#allocation4], 0  ;;  %s4055_s29 = smov 0   ;;  %s4057_s30 = smov 0  }
   0x6   :  { %s4059_s15 = smov 0  }
   0x7 LB: > { %4835 = sst [smem:[#allocation6_spill]] %s3953_s30  ;;  %s34_s17 = sadd.s32 1, %s3953_s30  ;;  %s3957_s15 = sphi %s4059_s15, %s25_s15   ;;  %s3953_s30 = sphi %s4057_s30, %s4847_s30   ;;  %s3949_s29 = sphi %s4055_s29, %s4846_s29  }
   0x8   : > { %4836 = sst [smem:[#allocation7_spill]] %s3957_s15  ;;  %p35_p0 = scmp.ge.s32.totalorder %s34_s17, 2 }
   0x9   : > { %p3188_p1 = scmp.ge.s32.totalorder %s3957_s15, 1  ;;  %p492_p2 = scmp.lt.s32.totalorder %s3957_s15, 3 }
   0xa   : > { %s4849_s17 = smov (%p35_p0, %s34_s17), 0 }
   0xb   : > { %4837 = sst [smem:[#allocation8_spill]] %s4849_s17  ;;  %p493_p3 = pnand %p3188_p1, %p492_p2 }
   0xc   : > { %p571_p4 = scmp.lt.s32.totalorder (!%p493_p3), %s3949_s29, 1  ;;  %s4838_s3 = sld [smem:[#allocation9_spill]] (!%p493_p3) }
   0xd   : > { %496 = sbr.rel (%p493_p3) target bundleno = 5181 (0x143d), region = 76  ;;  %s4839_s4 = sld [smem:[#allocation10_spill]] (!%p493_p3) }
   0xe   : > { %p3198_p5 = scmp.ne.s32.totalorder (!%p493_p3), %s3949_s29, 0 }
  0x12   : > { %s4078_s18 = scalar_select %p571_p4, %s3949_s29, 1 }
  0x14   : > { %s3189_s19 = sshll.u32 %s4078_s18, 3  ;;  %s3280_s20 = sshll.u32 %s4078_s18, 4 }
  0x15   : > { %s4085_s23 = scalar_lea.vmem %s4838_s3, %s3189_s19  ;;  %s4090_s26 = scalar_lea.vmem %s4839_s4, %s3280_s20 }
  0x16   : > { %s582_s16 = scalar_lea.vmem %s4819_s5, %s4078_s18  ;;  %s4099_s14 = scalar_lea.vmem %s4820_s6, %s3280_s20 }
  0x17   : > { %s4104_s21 = scalar_lea.vmem %s4821_s7, %s3280_s20  ;;  %s595_s24 = scalar_lea.vmem %s4822_s8, %s4078_s18 }
  0x18   : > { %s3283_s25 = sshll.u32 %s4078_s18, 5  ;;  %605 = sbr.rel (%p3198_p5) target bundleno = 254 (0xfe), region = 80 }
  0x19   : > { %s4114_s27 = scalar_lea.vmem %s4823_s9, %s3283_s25 }
  0x1d   : > { %v3701_v0 = vld [vmem:[%s4815_s1 + $0x18] sm:$0xff]   ;;  %v3959_v1 = vmov 0.0   ;;  %v3702_v2 = vld [vmem:[%s4815_s1 + $0x10] sm:$0xff]   ;;  %vm3960_vm0 = vmmov 0   ;;  %v3703_v3 = vld [vmem:[%s4815_s1 + $0x8] sm:$0xff]   ;;  %vm661_vm1 = vcmask 523264  }
  0x1e   : > { %3618 = vmatprep.subr.bf16.mxu1 %v3959_v1  ;;  %3386 = vmatprep.subr.bf16.mxu0 %v3959_v1  ;;  %v3704_v4 = vld [vmem:[%s4815_s1] sm:$0xff]   ;;  %v608_v5 = vld [vmem:[%s4814_s0 + $0x10] sm:$0xff]  ;;  %v609_v6 = vld [vmem:[%s4814_s0 + $0x18] sm:$0xff]  ;;  %vm737_vm2 = vcmask 261120  }
  0x1f   : > { %3622 = vmatpush3.bf16.msra.mxu1 %v3701_v0  ;;  %3387 = vmatpush3.bf16.msra.mxu0 %v3701_v0  ;;  %v610_v7 = vld [vmem:[%s4814_s0 + $0x20] sm:$0xff]  ;;  %v607_v9 = vld [vmem:[%s4814_s0 + $0x8] sm:$0xff]  ;;  %v3284_v12 = vpack.c.bf16 %v609_v6, %v608_v5  ;;  %v730_v18 = vld [vmem:[%s4816_s2 + $0x10] sm:$0xff] }
  0x20   : > { %3619 = vmatprep.subr.bf16.mxu1 %v3959_v1  ;;  %3388 = vmatprep.subr.bf16.mxu0 %v3959_v1  ;;  %v606_v8 = vld [vmem:[%s4814_s0] sm:$0xff]  ;;  %v611_v10 = vld [vmem:[%s4814_s0 + $0x28] sm:$0xff]  ;;  %v614_v11 = vpack.c.bf16 %v610_v7, %v609_v6 }
  0x21   : > { %3398 = vmatprep.mubr.msk.bf16.mxu1 %vm3960_vm0, %v3959_v1  ;;  %3394 = vmatprep.mubr.msk.bf16.mxu0 %vm3960_vm0, %v3959_v1  ;;  %v612_v13 = vpack.c.bf16 %v607_v9, %v606_v8  ;;  %v615_v14 = vpack.c.bf16 %v611_v10, %v611_v10  ;;  %v728_v21 = vld [vmem:[%s4816_s2] sm:$0xff]  ;;  %v729_v26 = vld [vmem:[%s4816_s2 + $0x8] sm:$0xff] }
  0x22   : > { %v624_v15 = vunpack.c.h.b16 %v614_v11 }
  0x23   : > { %3623 = vmatpush3.bf16.msra.mxu1 %v3702_v2  ;;  %3389 = vmatpush3.bf16.msra.mxu0 %v3702_v2  ;;  %v625_v16 = vunpack.c.l.b16 %v615_v14 }
  0x24   : > { %3620 = vmatprep.subr.bf16.mxu1 %v3959_v1  ;;  %3390 = vmatprep.subr.bf16.mxu0 %v3959_v1 }
  0x25   : > { %v636_v17 = vpack.c.b16 %v625_v16, %v624_v15 }
  0x27   : > { %3624 = vmatpush3.bf16.msra.mxu1 %v3703_v3  ;;  %3391 = vmatpush3.bf16.msra.mxu0 %v3703_v3 }
  0x28   : > { %3621 = vmatprep.subr.bf16.mxu1 %v3959_v1  ;;  %3392 = vmatprep.subr.bf16.mxu0 %v3959_v1 }
  0x2b   : > { %3625 = vmatpush3.bf16.msra.mxu1 %v3704_v4  ;;  %3393 = vmatpush3.bf16.msra.mxu0 %v3704_v4 }
  0x2e   : > { %3399 = vmatmul.mubr.msk.bf16.vlgmr.msra.gmra.mxu1 %vm661_vm1, %v3284_v12  ;;  %3395 = vmatmul.mubr.msk.bf16.vlgmr.msra.gmra.mxu0 %vm661_vm1, %v612_v13 }
  0x2f   : > { %3402 = vmatprep.mubr.msk.bf16.mxu1 %vm3960_vm0, %v3959_v1 }
  0x36   : > { %3403 = vmatmul.mubr.msk.bf16.gmra.mxu1 %vm661_vm1, %v636_v17 }
  0xee   : > { %v713_v19 = vpop.f32.mrf.mxu1  ;;  %v705_v20 = vpop.f32.mrf.mxu0 }
  0xef   : > { %v733_v22 = vadd.f32 %v730_v18, %v713_v19  ;;  %v731_v23 = vadd.f32 %v728_v21, %v705_v20 }
  0xf0   : > { %v3400_v24 = vpop.f32.mrf.mxu1  ;;  %v3396_v25 = vpop.f32.mrf.mxu0 }
  0xf1   : > { %740 = vst.msk [vmem:[#allocation2 + $0x10] sm:$0xff] %vm737_vm2, %v733_v22  ;;  %738 = vst.msk [vmem:[#allocation2] sm:$0xff] %vm737_vm2, %v731_v23 }
  0xf2   : > { %v716_v27 = vpop.f32.mrf.mxu1  ;;  %v708_v28 = vpop.f32.mrf.mxu0 }
  0xf3   : > { %v734_v29 = vadd.f32 %v728_v21, %v716_v27  ;;  %v732_v30 = vadd.f32 %v729_v26, %v708_v28 }
  0xf4   : > { %v3401_v31 = vpop.f32.mrf.mxu1  ;;  %v3397_v32 = vpop.f32.mrf.mxu0 }
  0xf5   : > { %741 = vst.msk [vmem:[#allocation2 + $0x18] sm:$0xff] %vm737_vm2, %v734_v29  ;;  %739 = vst.msk [vmem:[#allocation2 + $0x8] sm:$0xff] %vm737_vm2, %v732_v30 }
  0xf6   : > { %v721_v33 = vpop.f32.mrf.mxu1 }
  0xf7   : > { %v735_v34 = vadd.f32 %v729_v26, %v721_v33 }
  0xf8   : > { %v3404_v35 = vpop.f32.mrf.mxu1 }
  0xf9   : > { %742 = vst.msk [vmem:[#allocation2 + $0x20] sm:$0xff] %vm737_vm2, %v735_v34 }
  0xfa   : > { %v724_v36 = vpop.f32.mrf.mxu1 }
  0xfb   : > { %v736_v37 = vadd.f32 %v730_v18, %v724_v36 }
  0xfc   : > { %v3405_v38 = vpop.f32.mrf.mxu1 }
  0xfd   : > { %743 = vst.msk [vmem:[#allocation2 + $0x28] sm:$0xff] %vm737_vm2, %v736_v37 }
  0xfe PF: > { %v745_v39 = vld [vmem:[#allocation2] sm:$0xff]  ;;  %vm751_vm3 = vcmask 261120   ;;  %v747_v40 = vld [vmem:[#allocation2 + $0x10] sm:$0xff]  ;;  %v746_v41 = vld [vmem:[#allocation2 + $0x8] sm:$0xff]  ;;  %v3961_v18 = vmov 0.0   ;;  %vm3962_vm4 = vmmov 0   ;;  %v831_v29 = vlaneseq }
  0xff   : > { %v752_v42 = vsel %vm751_vm3, %v745_v39, 0.0  ;;  %v758_v43 = vsel %vm751_vm3, %v747_v40, 0.0  ;;  %v748_v44 = vld [vmem:[#allocation2 + $0x18] sm:$0xff]  ;;  %v755_v47 = vsel %vm751_vm3, %v746_v41, 0.0  ;;  %v3750_v17 = vld [vmem:[%s4090_s26 + $0x8] sm:$0xff]   ;;  %3406 = vmatprep.subr.bf16.mxu1 %v3961_v18  ;;  %3410 = vmatprep.mubr.msk.bf16.mxu1 %vm3962_vm4, %v3961_v18  ;;  %v3751_v19 = vld [vmem:[%s4090_s26] sm:$0xff]  }
 0x100   : > { %v749_v45 = vld [vmem:[#allocation2 + $0x20] sm:$0xff]  ;;  %753 = vadd.xlane.f32.xlu0 %v752_v42  ;;  %759 = vadd.xlane.f32.xlu1 %v758_v43  ;;  %v761_v48 = vsel %vm751_vm3, %v748_v44, 0.0  ;;  %v4208_v35 = vshrl.u32 %v831_v29, 7  ;;  %vm964_vm5 = vcmask 64512   ;;  %s3963_s4 = smov 96   ;;  %vm1105_vm7 = vcmask 195584  }
 0x101   : > { %v764_v49 = vsel %vm751_vm3, %v749_v45, 0.0  ;;  %3407 = vmatpush3.bf16.msra.mxu1 %v3750_v17  ;;  %s3965_s20 = smov 88   ;;  %vm1187_vm8 = vcmask 1043456   ;;  %s3966_s28 = smov 120   ;;  %vm2405_vm9 = vcmask 130048   ;;  %vm2796_vm10 = vcmask 523264  }
 0x102   : > { %3408 = vmatprep.subr.bf16.mxu1 %v3961_v18  ;;  %s3967_s19 = smov 56   ;;  %s3968_s22 = smov 80  }
 0x103   : > { %s3969_s25 = smov 112   ;;  %s3970_s30 = smov 48  }
 0x104   : > { %v750_v46 = vld [vmem:[#allocation2 + $0x28] sm:$0xff]  ;;  %756 = vadd.xlane.f32.xlu0 %v755_v47  ;;  %762 = vadd.xlane.f32.xlu1 %v761_v48  ;;  %s3971_s17 = smov 72   ;;  %s3972_s13 = smov 104  }
 0x105   : > { %v767_v50 = vsel %vm751_vm3, %v750_v46, 0.0  ;;  %3409 = vmatpush3.bf16.msra.mxu1 %v3751_v19  ;;  %s3973_s15 = smov 40   ;;  %s3974_s26 = smov 8  }
 0x106   : > { %s3975_s3 = smov 16   ;;  %p3265_p6 = scmp.ne.s32.totalorder %s3949_s29, 1 }
 0x108   : > { %765 = vadd.xlane.f32.xlu0 %v764_v49  ;;  %768 = vadd.xlane.f32.xlu1 %v767_v50 }
 0x189   : > { %v754_v51 = vpop.xlane.xlu0 %753  ;;  %v760_v52 = vpop.xlane.xlu1 %759 }
 0x18a   : > { %v771_v53 = vmul.f32 0.03125, %v754_v51  ;;  %v773_v54 = vmul.f32 0.03125, %v760_v52 }
 0x18c   : > { %v4171_v55 = vsub.f32 %v745_v39, %v771_v53  ;;  %v4173_v56 = vsub.f32 %v747_v40, %v773_v54  ;;  %v833_v40 = vsub.s32 0, %v4208_v35 }
 0x18d   : > { %v757_v57 = vpop.xlane.xlu0 %756  ;;  %v763_v58 = vpop.xlane.xlu1 %762 }
 0x18e   : > { %v772_v59 = vmul.f32 0.03125, %v757_v57  ;;  %v774_v60 = vmul.f32 0.03125, %v763_v58  ;;  %v783_v61 = vmul.f32 %v4171_v55, %v4171_v55  ;;  %v785_v62 = vmul.f32 %v4173_v56, %v4173_v56 }
 0x190   : > { %v4179_v63 = vsub.f32 %v746_v41, %v772_v59  ;;  %v4181_v0 = vsub.f32 %v748_v44, %v774_v60  ;;  %v789_v1 = vsel %vm751_vm3, %v783_v61, 0.0  ;;  %v795_v4 = vsel %vm751_vm3, %v785_v62, 0.0  ;;  %v744_v41 = vld [vmem:[%s4085_s23] sm:$0x3f] }
 0x191   : > { %790 = vadd.xlane.f32.xlu0 %v789_v1  ;;  %v766_v2 = vpop.xlane.xlu0 %765  ;;  %v769_v3 = vpop.xlane.xlu1 %768  ;;  %v834_v44 = vrot.slane %v744_v41, %v833_v40 }
 0x192   : > { %v775_v5 = vmul.f32 0.03125, %v766_v2  ;;  %v776_v6 = vmul.f32 0.03125, %v769_v3  ;;  %v784_v7 = vmul.f32 %v4179_v63, %v4179_v63  ;;  %v786_v8 = vmul.f32 %v4181_v0, %v4181_v0 }
 0x194   : > { %v4189_v9 = vsub.f32 %v749_v45, %v775_v5  ;;  %v4191_v10 = vsub.f32 %v750_v46, %v776_v6  ;;  %v792_v11 = vsel %vm751_vm3, %v784_v7, 0.0  ;;  %v798_v12 = vsel %vm751_vm3, %v786_v8, 0.0 }
 0x195   : > { %796 = vadd.xlane.f32.xlu0 %v795_v4  ;;  %793 = vadd.xlane.f32.xlu1 %v792_v11  ;;  %v843_v45 = vsub.s32 1, %v4208_v35 }
 0x196   : > { %v787_v13 = vmul.f32 %v4189_v9, %v4189_v9  ;;  %v788_v14 = vmul.f32 %v4191_v10, %v4191_v10 }
 0x197   : > { %v844_v49 = vrot.slane %v744_v41, %v843_v45 }
 0x198   : > { %v801_v15 = vsel %vm751_vm3, %v787_v13, 0.0  ;;  %v804_v16 = vsel %vm751_vm3, %v788_v14, 0.0 }
 0x199   : > { %799 = vadd.xlane.f32.xlu1 %v798_v12  ;;  %802 = vadd.xlane.f32.xlu0 %v801_v15 }
 0x19d   : > { %805 = vadd.xlane.f32.xlu1 %v804_v16 }
 0x21a   : > { %v791_v20 = vpop.xlane.xlu0 %790 }
 0x21b   : > { %v807_v21 = vmul.f32 0.03125, %v791_v20 }
 0x21d   : > { %v813_v22 = vadd.f32 1e-05, %v807_v21 }
 0x21e   : > { %v794_v23 = vpop.xlane.xlu1 %793  ;;  %v797_v24 = vpop.xlane.xlu0 %796 }
 0x21f   : > { %3760 = vrsqrt.f32 %v813_v22  ;;  %v808_v25 = vmul.f32 0.03125, %v794_v23  ;;  %v809_v26 = vmul.f32 0.03125, %v797_v24 }
 0x221   : > { %v814_v27 = vadd.f32 1e-05, %v808_v25  ;;  %v815_v28 = vadd.f32 1e-05, %v809_v26 }
 0x222   : > { %v800_v30 = vpop.xlane.xlu1 %799  ;;  %v803_v31 = vpop.xlane.xlu0 %802 }
 0x223   : > { %3762 = vrsqrt.f32 %v814_v27  ;;  %v810_v32 = vmul.f32 0.03125, %v800_v30  ;;  %v811_v34 = vmul.f32 0.03125, %v803_v31 }
 0x224   : > { %3764 = vrsqrt.f32 %v815_v28 }
 0x225   : > { %v816_v33 = vadd.f32 1e-05, %v810_v32  ;;  %v817_v38 = vadd.f32 1e-05, %v811_v34 }
 0x226   : > { %v806_v36 = vpop.xlane.xlu1 %805 }
 0x227   : > { %3766 = vrsqrt.f32 %v816_v33  ;;  %v812_v37 = vmul.f32 0.03125, %v806_v36 }
 0x229   : > { %v818_v39 = vadd.f32 1e-05, %v812_v37 }
 0x22b   : > { %3768 = vrsqrt.f32 %v818_v39 }
 0x22c   : > { %v3761_v42 = vpop.eup %3760  ;;  %3770 = vrsqrt.f32 %v817_v38 }
 0x22d   : > { %v825_v43 = vmul.f32 %v3761_v42, %v4171_v55 }
 0x22f   : > { %v835_v48 = vmul.f32 %v834_v44, %v825_v43 }
 0x230   : > { %v3763_v46 = vpop.eup %3762 }
 0x231   : > { %v826_v47 = vmul.f32 %v3763_v46, %v4179_v63  ;;  %v3765_v50 = vpop.eup %3764  ;;  %v845_v53 = vadd.f32 %v844_v49, %v835_v48  ;;  %v4260_v46 = vand.u32 127, %v831_v29 }
 0x232   : > { %v827_v57 = vmul.f32 %v3765_v50, %v4173_v56 }
 0x233   : > { %v836_v51 = vmul.f32 %v834_v44, %v826_v47  ;;  %vm945_vm6 = vcmp.lt.s32.totalorder %v4260_v46, 17 }
 0x234   : > { %v3767_v52 = vpop.eup %3766  ;;  %v837_v61 = vmul.f32 %v834_v44, %v827_v57 }
 0x235   : > { %v846_v54 = vadd.f32 %v844_v49, %v836_v51  ;;  %v828_v58 = vmul.f32 %v3767_v52, %v4181_v0 }
 0x236   : > { %v847_v2 = vadd.f32 %v844_v49, %v837_v61 }
 0x237   : > { %v851_v59 = vpack.c.bf16 %v846_v54, %v845_v53  ;;  %v838_v60 = vmul.f32 %v834_v44, %v828_v58 }
 0x238   : > { %v3769_v55 = vpop.eup %3768 }
 0x239   : > { %3411 = vmatmul.mubr.msk.bf16.vlgmr.msra.gmra.mxu1 %vm751_vm3, %v851_v59  ;;  %v3771_v62 = vpop.eup %3770  ;;  %v848_v63 = vadd.f32 %v844_v49, %v838_v60  ;;  %v830_v1 = vmul.f32 %v3769_v55, %v4191_v10  ;;  %v3207_v10 = vld [vmem:[%s582_s16] ss:$0 sm:$0xff]  ;;  %s3964_s16 = smov 64  }
 0x23a   : > { %3414 = vmatprep.mubr.msk.bf16.mxu1 %vm3962_vm4, %v3961_v18  ;;  %v829_v3 = vmul.f32 %v3771_v62, %v4189_v9 }
 0x23b   : > { %v852_v56 = vpack.c.bf16 %v848_v63, %v847_v2  ;;  %v840_v4 = vmul.f32 %v834_v44, %v830_v1 }
 0x23c   : > { %v839_v0 = vmul.f32 %v834_v44, %v829_v3 }
 0x23d   : > { %v850_v5 = vadd.f32 %v844_v49, %v840_v4 }
 0x23e   : > { %v849_v6 = vadd.f32 %v844_v49, %v839_v0 }
 0x240   : > { %v853_v7 = vpack.c.bf16 %v850_v5, %v849_v6 }
 0x241   : > { %3415 = vmatmul.mubr.msk.bf16.gmra.mxu1 %vm751_vm3, %v852_v56 }
 0x242   : > { %3418 = vmatprep.mubr.msk.bf16.mxu1 %vm3962_vm4, %v3961_v18 }
 0x249   : > { %3419 = vmatmul.mubr.msk.bf16.gmra.mxu1 %vm751_vm3, %v853_v7 }
 0x2f9   : > { %v920_v8 = vpop.f32.mrf.mxu1 }
 0x2fa   : > { %v921_v12 = vadd.f32 %v3207_v10, %v920_v8 }
 0x2fb   : > { %v3412_v9 = vpop.f32.mrf.mxu1 }
 0x2fd   : > { %v923_v11 = vpop.f32.mrf.mxu1 }
 0x2fe   : > { %v924_v13 = vadd.f32 %v3207_v10, %v923_v11 }
 0x2ff   : > { %v3413_v14 = vpop.f32.mrf.mxu1 }
 0x300   : > { %v4231_v15 = vpack.c.bf16 %v924_v13, %v921_v12 }
 0x301   : > { %v928_v16 = vpop.f32.mrf.mxu1 }
 0x302   : > { %v929_v17 = vadd.f32 %v3207_v10, %v928_v16  ;;  %960 = vrot.lane.b32.xlu1 %v4231_v15, %s3963_s4  ;;  %3426 = vmatprep.mubr.msk.bf16.mxu1 %vm964_vm5, %v4231_v15 }
 0x303   : > { %v3416_v19 = vpop.f32.mrf.mxu1 }
 0x304   : > { %v4236_v20 = vpack.c.bf16 %v929_v17, %v929_v17 }
 0x305   : > { %v931_v21 = vpop.f32.mrf.mxu1 }
 0x306   : > { %962 = vrot.lane.b32.xlu0 %v4236_v20, %s3963_s4  ;;  %v932_v24 = vadd.f32 %v3207_v10, %v931_v21 }
 0x307   : > { %v3417_v22 = vpop.f32.mrf.mxu1 }
 0x308   : > { %v947_v27 = vpack.c.bf16 %v932_v24, %v929_v17 }
 0x309   : > { %v936_v23 = vpop.f32.mrf.mxu1 }
 0x30a   : > { %v937_v28 = vadd.f32 %v3207_v10, %v936_v23  ;;  %v955_v34 = vunpack.c.h.b16 %v947_v27 }
 0x30b   : > { %v3420_v25 = vpop.f32.mrf.mxu1 }
 0x30d   : > { %v939_v26 = vpop.f32.mrf.mxu1 }
 0x30e   : > { %v940_v30 = vadd.f32 %v3207_v10, %v939_v26 }
 0x30f   : > { %v3421_v31 = vpop.f32.mrf.mxu1 }
 0x310   : > { %v948_v32 = vpack.c.bf16 %v940_v30, %v937_v28  ;;  %v4239_v33 = vpack.c.bf16 %v940_v30, %v940_v30 }
 0x312   : > { %v956_v36 = vunpack.c.l.b16 %v948_v32  ;;  %1029 = vrot.lane.b32.xlu1 %v4239_v33, %s3963_s4 }
 0x314   : > { %v4242_v37 = vpack.c.b16 %v956_v36, %v955_v34 }
 0x316   : > { %1027 = vrot.lane.b32.xlu1 %v4242_v37, %s3963_s4  ;;  %3434 = vmatprep.mubr.msk.bf16.mxu0 %vm964_vm5, %v4242_v37  ;;  %s3976_s4 = smov 24  }
 0x374   : > { %v961_v40 = vpop.permute.xlu1 %960 }
 0x375   : > { %v972_v41 = vsel %vm964_vm5, %v961_v40, 0 }
 0x378   : > { %v963_v38 = vpop.permute.xlu0 %962 }
 0x379   : > { %3626 = vmatprep.subr.msk.bf16.mxu1 %vm964_vm5, %v963_v38  ;;  %v975_v39 = vsel %vm964_vm5, %v963_v38, 0 }
 0x37a   : > { %3423 = vmatpush3.bf16.xpose.msra.mxu1 %v975_v39 }
 0x37b   : > { %3627 = vmatprep.subr.msk.bf16.mxu1 %vm964_vm5, %v961_v40 }
 0x382   : > { %3425 = vmatpush3.bf16.xpose.msra.mxu1 %v972_v41 }
 0x384   : > { %v1030_v42 = vpop.permute.xlu1 %1029 }
 0x385   : > { %3628 = vmatprep.subr.msk.bf16.mxu0 %vm964_vm5, %v1030_v42  ;;  %v1041_v43 = vsel %vm964_vm5, %v1030_v42, 0 }
 0x386   : > { %3431 = vmatpush3.bf16.xpose.msra.mxu0 %v1041_v43 }
 0x388   : > { %v1028_v44 = vpop.permute.xlu1 %1027 }
 0x389   : > { %3427 = vmatmul.mubr.msk.bf16.vlgmr.msra.gmra.mxu1 %vm964_vm5, %v4236_v20  ;;  %3629 = vmatprep.subr.msk.bf16.mxu0 %vm964_vm5, %v1028_v44  ;;  %v1038_v45 = vsel %vm964_vm5, %v1028_v44, 0 }
 0x38e   : > { %3433 = vmatpush3.bf16.xpose.msra.mxu0 %v1038_v45 }
 0x395   : > { %3435 = vmatmul.mubr.msk.bf16.vlgmr.msra.gmra.mxu0 %vm964_vm5, %v4239_v33 }
 0x449   : > { %v3428_v47 = vpop.f32.mrf.mxu1 }
 0x44a   : > { %v1093_v49 = vmul.f32 0.35355338, %v3428_v47 }
 0x44b   : > { %v1011_v48 = vpop.f32.mrf.mxu1 }
 0x44c   : > { %v1091_v50 = vmul.f32 0.35355338, %v1011_v48  ;;  %v1101_v29 = vsel %vm945_vm6, %v1093_v49, -1e+30 }
 0x44d   : > { %v3429_v51 = vpop.f32.mrf.mxu1  ;;  %v1112_v59 = vsel %vm1105_vm7, %v1101_v29, -inf }
 0x44e   : > { %v1099_v52 = vsel %vm945_vm6, %v1091_v50, -1e+30 }
 0x44f   : > { %v1014_v53 = vpop.f32.mrf.mxu1  ;;  %v1106_v54 = vsel %vm1105_vm7, %v1099_v52, -inf }
 0x450   : > { %v1092_v57 = vmul.f32 0.35355338, %v1014_v53  ;;  %1107 = vmax.xlane.f32.xlu0 %v1106_v54 }
 0x452   : > { %v1100_v58 = vsel %vm945_vm6, %v1092_v57, -1e+30 }
 0x453   : > { %v1109_v60 = vsel %vm1105_vm7, %v1100_v58, -inf }
 0x454   : > { %1113 = vmax.xlane.f32.xlu0 %v1112_v59  ;;  %1110 = vmax.xlane.f32.xlu1 %v1109_v60 }
 0x455   : > { %v3436_v55 = vpop.f32.mrf.mxu0 }
 0x456   : > { %v1096_v61 = vmul.f32 0.35355338, %v3436_v55 }
 0x457   : > { %v1077_v62 = vpop.f32.mrf.mxu0 }
 0x458   : > { %v1094_v63 = vmul.f32 0.35355338, %v1077_v62  ;;  %v1104_v1 = vsel %vm945_vm6, %v1096_v61, -1e+30 }
 0x459   : > { %v3437_v2 = vpop.f32.mrf.mxu0  ;;  %v1121_v3 = vsel %vm1105_vm7, %v1104_v1, -inf }
 0x45a   : > { %1122 = vmax.xlane.f32.xlu1 %v1121_v3  ;;  %v1102_v56 = vsel %vm945_vm6, %v1094_v63, -1e+30 }
 0x45b   : > { %v1080_v4 = vpop.f32.mrf.mxu0  ;;  %v1115_v0 = vsel %vm1105_vm7, %v1102_v56, -inf }
 0x45c   : > { %v1095_v5 = vmul.f32 0.35355338, %v1080_v4  ;;  %1116 = vmax.xlane.f32.xlu0 %v1115_v0 }
 0x45e   : > { %v4280_v6 = vsel %vm945_vm6, %v1095_v5, -1e+30 }
 0x45f   : > { %v1118_v7 = vsel %vm1105_vm7, %v4280_v6, -inf }
 0x460   : > { %1119 = vmax.xlane.f32.xlu0 %v1118_v7 }
 0x46b   : > { %1176 = vrot.lane.b32.xlu1 %v4231_v15, %s3964_s16 }
 0x46f   : > { %1307 = vrot.lane.b32.xlu1 %v4236_v20, %s3965_s20 }
 0x473   : > { %1241 = vrot.lane.b32.xlu1 %v4239_v33, %s3964_s16 }
 0x476   : > { %1178 = vrot.lane.b32.xlu0 %v4236_v20, %s3964_s16 }
 0x477   : > { %1305 = vrot.lane.b32.xlu1 %v4231_v15, %s3965_s20 }
 0x4d9   : > { %v1108_v8 = vpop.xlane.xlu0 %1107 }
 0x4da   : > { %v1124_v10 = vsub.f32 %v1099_v52, %v1108_v8 }
 0x4dc   : > { %v1130_v14 = vmul.f32 1.442695, %v1124_v10 }
 0x4dd   : > { %v1114_v9 = vpop.xlane.xlu0 %1113  ;;  %v1111_v11 = vpop.xlane.xlu1 %1110 }
 0x4de   : > { %v1126_v12 = vsub.f32 %v1101_v29, %v1114_v9  ;;  %v1125_v13 = vsub.f32 %v1100_v58, %v1111_v11 }
 0x4e0   : > { %v1134_v16 = vmul.f32 1.442695, %v1126_v12  ;;  %v1132_v17 = vmul.f32 1.442695, %v1125_v13 }
 0x4e2   : > { %3772 = vpow2.f32 %v1134_v16 }
 0x4e3   : > { %3774 = vpow2.f32 %v1132_v17  ;;  %v1123_v19 = vpop.xlane.xlu1 %1122 }
 0x4e4   : > { %3776 = vpow2.f32 %v1130_v14  ;;  %v1129_v21 = vsub.f32 %v1104_v1, %v1123_v19 }
 0x4e5   : > { %v1117_v22 = vpop.xlane.xlu0 %1116 }
 0x4e6   : > { %v1140_v23 = vmul.f32 1.442695, %v1129_v21  ;;  %v1127_v24 = vsub.f32 %v1102_v56, %v1117_v22 }
 0x4e7   : > { %v1177_v25 = vpop.permute.xlu1 %1176 }
 0x4e8   : > { %3778 = vpow2.f32 %v1140_v23  ;;  %v1136_v26 = vmul.f32 1.442695, %v1127_v24 }
 0x4e9   : > { %v1120_v27 = vpop.xlane.xlu0 %1119 }
 0x4ea   : > { %3780 = vpow2.f32 %v1136_v26  ;;  %v1128_v50 = vsub.f32 %v4280_v6, %v1120_v27 }
 0x4eb   : > { %v1308_v28 = vpop.permute.xlu1 %1307 }
 0x4ec   : > { %3632 = vmatprep.subr.msk.bf16.mxu0 %vm964_vm5, %v1308_v28  ;;  %v1319_v30 = vsel %vm964_vm5, %v1308_v28, 0  ;;  %v1138_v51 = vmul.f32 1.442695, %v1128_v50 }
 0x4ed   : > { %v1179_v31 = vpop.permute.xlu0 %1178  ;;  %3455 = vmatpush3.bf16.xpose.msra.mxu0 %v1319_v30 }
 0x4ee   : > { %3630 = vmatprep.subr.msk.bf16.mxu1 %vm1187_vm8, %v1179_v31  ;;  %v1189_v32 = vsel %vm1187_vm8, %v1179_v31, 0  ;;  %3782 = vpow2.f32 %v1138_v51 }
 0x4ef   : > { %v3773_v34 = vpop.eup %3772  ;;  %3439 = vmatpush3.bf16.msra.mxu1 %v1189_v32  ;;  %v1242_v36 = vpop.permute.xlu1 %1241 }
 0x4f0   : > { %v3775_v38 = vpop.eup %3774  ;;  %3440 = vmatprep.subr.bf16.mxu1 %v1177_v25  ;;  %v1148_v39 = vsel %vm1105_vm7, %v3773_v34, 0.0  ;;  %v1251_v4 = vsel %vm1187_vm8, %v1242_v36, 0 }
 0x4f1   : > { %v3777_v40 = vpop.eup %3776  ;;  %1149 = vadd.xlane.f32.xlu0 %v1148_v39  ;;  %v1145_v41 = vsel %vm1105_vm7, %v3775_v38, 0.0 }
 0x4f2   : > { %1146 = vadd.xlane.f32.xlu1 %v1145_v41  ;;  %v1142_v44 = vsel %vm1105_vm7, %v3777_v40, 0.0 }
 0x4f3   : > { %3441 = vmatpush3.bf16.msra.mxu1 %v1177_v25  ;;  %v1306_v42 = vpop.permute.xlu1 %1305 }
 0x4f4   : > { %v1316_v43 = vsel %vm964_vm5, %v1306_v42, 0  ;;  %3631 = vmatprep.subr.msk.bf16.mxu1 %vm1187_vm8, %v1242_v36  ;;  %3633 = vmatprep.subr.msk.bf16.mxu0 %vm964_vm5, %v1306_v42 }
 0x4f5   : > { %v3779_v45 = vpop.eup %3778  ;;  %1143 = vadd.xlane.f32.xlu0 %v1142_v44  ;;  %3457 = vmatpush3.bf16.xpose.msra.mxu0 %v1316_v43 }
 0x4f6   : > { %v1157_v47 = vsel %vm1105_vm7, %v3779_v45, 0.0 }
 0x4f7   : > { %v3781_v48 = vpop.eup %3780  ;;  %1158 = vadd.xlane.f32.xlu1 %v1157_v47 }
 0x4f8   : > { %v1151_v49 = vsel %vm1105_vm7, %v3781_v48, 0.0 }
 0x4fb   : > { %1152 = vadd.xlane.f32.xlu1 %v1151_v49  ;;  %v3783_v52 = vpop.eup %3782 }
 0x4fc   : > { %v1154_v53 = vsel %vm1105_vm7, %v3783_v52, 0.0 }
 0x50b   : > { %1239 = vrot.lane.b32.xlu0 %v4242_v37, %s3964_s16 }
 0x50c   : > { %1301 = vrot.lane.b32.xlu1 %v4231_v15, %s3966_s28 }
 0x510   : > { %1373 = vrot.lane.b32.xlu1 %v4242_v37, %s3965_s20 }
 0x514   : > { %1371 = vrot.lane.b32.xlu1 %v4239_v33, %s3966_s28 }
 0x52a   : > { %1155 = vadd.xlane.f32.xlu0 %v1154_v53 }
 0x540   : > { %1375 = vrot.lane.b32.xlu0 %v4239_v33, %s3965_s20 }
 0x544   : > { %1303 = vrot.lane.b32.xlu0 %v4236_v20, %s3966_s28 }
 0x548   : > { %1369 = vrot.lane.b32.xlu0 %v4242_v37, %s3966_s28 }
 0x57a   : > { %v1150_v54 = vpop.xlane.xlu0 %1149 }
 0x57b   : > { %v1147_v57 = vpop.xlane.xlu1 %1146  ;;  %3784 = vrcp.f32 %v1150_v54 }
 0x57c   : > { %3786 = vrcp.f32 %v1147_v57 }
 0x57e   : > { %v1144_v29 = vpop.xlane.xlu0 %1143 }
 0x57f   : > { %3788 = vrcp.f32 %v1144_v29 }
 0x580   : > { %v1159_v58 = vpop.xlane.xlu1 %1158 }
 0x581   : > { %3790 = vrcp.f32 %v1159_v58 }
 0x582   : > { %v1240_v0 = vpop.permute.xlu0 %1239 }
 0x584   : > { %v1153_v59 = vpop.xlane.xlu1 %1152 }
 0x585   : > { %3792 = vrcp.f32 %v1153_v59 }
 0x588   : > { %v1302_v60 = vpop.permute.xlu1 %1301  ;;  %v3785_v55 = vpop.eup %3784 }
 0x589   : > { %3458 = vmatprep.mubr.msk.bf16.mxu0 %vm964_vm5, %v1302_v60  ;;  %v3787_v61 = vpop.eup %3786  ;;  %v1168_v63 = vmul.f32 %v3785_v55, %v3773_v34 }
 0x58a   : > { %v1167_v2 = vmul.f32 %v3787_v61, %v3775_v38 }
 0x58b   : > { %v1173_v56 = vpack.c.bf16 %v1168_v63, %v1168_v63 }
 0x58c   : > { %v3789_v62 = vpop.eup %3788  ;;  %v1374_v21 = vpop.permute.xlu1 %1373 }
 0x58d   : > { %v1166_v1 = vmul.f32 %v3789_v62, %v3777_v40  ;;  %v1384_v22 = vsel %vm964_vm5, %v1374_v21, 0 }
 0x58e   : > { %v3791_v8 = vpop.eup %3790 }
 0x58f   : > { %v1172_v3 = vpack.c.bf16 %v1167_v2, %v1166_v1  ;;  %v1171_v11 = vmul.f32 %v3791_v8, %v3779_v45 }
 0x590   : > { %v1372_v23 = vpop.permute.xlu1 %1371 }
 0x591   : > { %3442 = vmatprep.mubr.msk.bf16.mxu1 %vm1105_vm7, %v1172_v3  ;;  %v1175_v16 = vpack.c.bf16 %v1171_v11, %v1171_v11 }
 0x592   : > { %3443 = vmatmul.mubr.msk.bf16.vlgmr.msra.gmra.mxu1 %vm1105_vm7, %v1173_v56  ;;  %v3793_v10 = vpop.eup %3792 }
 0x593   : > { %3447 = vmatpush3.bf16.msra.mxu1 %v1251_v4  ;;  %v1169_v12 = vmul.f32 %v3793_v10, %v3781_v48 }
 0x594   : > { %3448 = vmatprep.subr.bf16.mxu1 %v1240_v0 }
 0x597   : > { %3449 = vmatpush3.bf16.msra.mxu1 %v1240_v0 }
 0x5b3   : > { %v1156_v5 = vpop.xlane.xlu0 %1155 }
 0x5b4   : > { %3794 = vrcp.f32 %v1156_v5 }
 0x5b7   : > { %v1376_v6 = vpop.permute.xlu0 %1375 }
 0x5b8   : > { %3634 = vmatprep.subr.msk.bf16.mxu1 %vm964_vm5, %v1376_v6  ;;  %v1387_v17 = vsel %vm964_vm5, %v1376_v6, 0 }
 0x5bb   : > { %v1304_v7 = vpop.permute.xlu0 %1303 }
 0x5bc   : > { %3459 = vmatmul.mubr.msk.bf16.vlgmr.msra.gmra.mxu0 %vm964_vm5, %v1304_v7 }
 0x5bf   : > { %v1370_v19 = vpop.permute.xlu0 %1369 }
 0x5c1   : > { %v3795_v9 = vpop.eup %3794 }
 0x5c2   : > { %v1170_v13 = vmul.f32 %v3795_v9, %v3783_v52 }
 0x5c4   : > { %v1174_v14 = vpack.c.bf16 %v1170_v13, %v1169_v12 }
 0x5c6   : > { %3450 = vmatprep.mubr.msk.bf16.mxu1 %vm1105_vm7, %v1174_v14 }
 0x5c7   : > { %3451 = vmatmul.mubr.msk.bf16.vlgmr.msra.gmra.mxu1 %vm1105_vm7, %v1175_v16 }
 0x5c8   : > { %3463 = vmatpush3.bf16.xpose.msra.mxu1 %v1387_v17  ;;  %3466 = vmatprep.mubr.msk.bf16.mxu1 %vm964_vm5, %v1370_v19 }
 0x5c9   : > { %3635 = vmatprep.subr.msk.bf16.mxu1 %vm964_vm5, %v1374_v21 }
 0x5d0   : > { %3465 = vmatpush3.bf16.xpose.msra.mxu1 %v1384_v22 }
 0x5d7   : > { %3467 = vmatmul.mubr.msk.bf16.vlgmr.msra.gmra.mxu1 %vm964_vm5, %v1372_v23 }
 0x652   : > { %v4331_v24 = vpop.f32.mrf.mxu1 }
 0x654   : > { %v4333_v25 = vpop.f32.mrf.mxu1 }
 0x656   : > { %v3445_v26 = vpop.f32.mrf.mxu1 }
 0x658   : > { %v4340_v41 = vpop.f32.mrf.mxu1 }
 0x67c   : > { %v3460_v27 = vpop.f32.mrf.mxu0 }
 0x67d   : > { %v1439_v30 = vmul.f32 0.35355338, %v3460_v27 }
 0x67e   : > { %v1355_v28 = vpop.f32.mrf.mxu0 }
 0x67f   : > { %v1437_v31 = vmul.f32 0.35355338, %v1355_v28  ;;  %v1445_v40 = vsel %vm945_vm6, %v1439_v30, -1e+30 }
 0x680   : > { %v3461_v32 = vpop.f32.mrf.mxu0  ;;  %v1455_v43 = vsel %vm1105_vm7, %v1445_v40, -inf }
 0x681   : > { %v1443_v34 = vsel %vm945_vm6, %v1437_v31, -1e+30 }
 0x682   : > { %v1358_v36 = vpop.f32.mrf.mxu0  ;;  %v1449_v38 = vsel %vm1105_vm7, %v1443_v34, -inf }
 0x683   : > { %v1438_v39 = vmul.f32 0.35355338, %v1358_v36  ;;  %1450 = vmax.xlane.f32.xlu0 %v1449_v38 }
 0x685   : > { %v1444_v42 = vsel %vm945_vm6, %v1438_v39, -1e+30 }
 0x686   : > { %v1452_v44 = vsel %vm1105_vm7, %v1444_v42, -inf }
 0x687   : > { %v4346_v45 = vpop.f32.mrf.mxu1  ;;  %1456 = vmax.xlane.f32.xlu0 %v1455_v43  ;;  %1453 = vmax.xlane.f32.xlu1 %v1452_v44 }
 0x689   : > { %v4348_v47 = vpop.f32.mrf.mxu1 }
 0x68b   : > { %v3453_v48 = vpop.f32.mrf.mxu1 }
 0x68d   : > { %v4350_v49 = vpop.f32.mrf.mxu1 }
 0x697   : > { %v3468_v50 = vpop.f32.mrf.mxu1 }
 0x698   : > { %v1442_v51 = vmul.f32 0.35355338, %v3468_v50 }
 0x699   : > { %v1423_v52 = vpop.f32.mrf.mxu1 }
 0x69a   : > { %v1440_v53 = vmul.f32 0.35355338, %v1423_v52  ;;  %v1448_v54 = vsel %vm945_vm6, %v1442_v51, -1e+30 }
 0x69b   : > { %v3469_v57 = vpop.f32.mrf.mxu1  ;;  %v1464_v29 = vsel %vm1105_vm7, %v1448_v54, -inf }
 0x69c   : > { %1465 = vmax.xlane.f32.xlu1 %v1464_v29  ;;  %v1446_v58 = vsel %vm945_vm6, %v1440_v53, -1e+30 }
 0x69d   : > { %v1426_v59 = vpop.f32.mrf.mxu1  ;;  %v1458_v60 = vsel %vm1105_vm7, %v1446_v58, -inf }
 0x69e   : > { %v1441_v55 = vmul.f32 0.35355338, %v1426_v59  ;;  %1459 = vmax.xlane.f32.xlu0 %v1458_v60 }
 0x6a0   : > { %v1447_v61 = vsel %vm945_vm6, %v1441_v55, -1e+30 }
 0x6a1   : > { %v1461_v62 = vsel %vm1105_vm7, %v1447_v61, -inf }
 0x6a2   : > { %1462 = vmax.xlane.f32.xlu0 %v1461_v62 }
 0x70c   : > { %v1451_v63 = vpop.xlane.xlu0 %1450 }
 0x70d   : > { %v1467_v1 = vsub.f32 %v1443_v34, %v1451_v63 }
 0x70f   : > { %v1473_v2 = vmul.f32 1.442695, %v1467_v1 }
 0x710   : > { %v1457_v3 = vpop.xlane.xlu0 %1456  ;;  %v1454_v56 = vpop.xlane.xlu1 %1453 }
 0x711   : > { %3796 = vpow2.f32 %v1473_v2  ;;  %v1469_v4 = vsub.f32 %v1445_v40, %v1457_v3  ;;  %v1468_v0 = vsub.f32 %v1444_v42, %v1454_v56 }
 0x713   : > { %v1477_v5 = vmul.f32 1.442695, %v1469_v4  ;;  %v1475_v6 = vmul.f32 1.442695, %v1468_v0 }
 0x715   : > { %3798 = vpow2.f32 %v1477_v5 }
 0x716   : > { %3800 = vpow2.f32 %v1475_v6 }
 0x71e   : > { %v4361_v7 = vpop.eup %3796 }
 0x71f   : > { %v1485_v8 = vsel %vm1105_vm7, %v4361_v7, 0.0 }
 0x720   : > { %1486 = vadd.xlane.f32.xlu0 %v1485_v8 }
 0x722   : > { %v4365_v10 = vpop.eup %3798 }
 0x723   : > { %v4367_v9 = vpop.eup %3800  ;;  %v1491_v11 = vsel %vm1105_vm7, %v4365_v10, 0.0 }
 0x724   : > { %1492 = vadd.xlane.f32.xlu0 %v1491_v11  ;;  %v1488_v12 = vsel %vm1105_vm7, %v4367_v9, 0.0 }
 0x725   : > { %1489 = vadd.xlane.f32.xlu1 %v1488_v12  ;;  %v1466_v19 = vpop.xlane.xlu1 %1465 }
 0x726   : > { %v1472_v21 = vsub.f32 %v1448_v54, %v1466_v19 }
 0x727   : > { %v1460_v13 = vpop.xlane.xlu0 %1459 }
 0x728   : > { %v1483_v22 = vmul.f32 1.442695, %v1472_v21  ;;  %v1470_v23 = vsub.f32 %v1446_v58, %v1460_v13 }
 0x72a   : > { %v1479_v26 = vmul.f32 1.442695, %v1470_v23 }
 0x72b   : > { %v1463_v14 = vpop.xlane.xlu0 %1462 }
 0x72c   : > { %v1471_v16 = vsub.f32 %v1447_v61, %v1463_v14 }
 0x72e   : > { %v1481_v17 = vmul.f32 1.442695, %v1471_v16 }
 0x730   : > { %3802 = vpow2.f32 %v1481_v17 }
 0x731   : > { %3804 = vpow2.f32 %v1483_v22 }
 0x732   : > { %3806 = vpow2.f32 %v1479_v26 }
 0x736   : > { %1519 = vrot.lane.b32.xlu1 %v4231_v15, %s3967_s19 }
 0x73a   : > { %1649 = vrot.lane.b32.xlu1 %v4236_v20, %s3968_s22  ;;  %1521 = vrot.lane.b32.xlu0 %v4236_v20, %s3967_s19 }
 0x73d   : > { %v4381_v27 = vpop.eup %3802 }
 0x73e   : > { %1583 = vrot.lane.b32.xlu1 %v4239_v33, %s3967_s19  ;;  %1581 = vrot.lane.b32.xlu0 %v4242_v37, %s3967_s19  ;;  %v1497_v28 = vsel %vm1105_vm7, %v4381_v27, 0.0  ;;  %v4385_v30 = vpop.eup %3804 }
 0x73f   : > { %v1500_v31 = vsel %vm1105_vm7, %v4385_v30, 0.0  ;;  %v4389_v32 = vpop.eup %3806 }
 0x740   : > { %v1494_v34 = vsel %vm1105_vm7, %v4389_v32, 0.0 }
 0x742   : > { %1647 = vrot.lane.b32.xlu1 %v4231_v15, %s3968_s22 }
 0x75d   : > { %1498 = vadd.xlane.f32.xlu0 %v1497_v28 }
 0x766   : > { %1501 = vadd.xlane.f32.xlu1 %v1500_v31 }
 0x76a   : > { %1495 = vadd.xlane.f32.xlu1 %v1494_v34 }
 0x773   : > { %1717 = vrot.lane.b32.xlu0 %v4239_v33, %s3968_s22 }
 0x777   : > { %1645 = vrot.lane.b32.xlu0 %v4236_v20, %s3969_s25 }
 0x77b   : > { %1643 = vrot.lane.b32.xlu1 %v4231_v15, %s3969_s25  ;;  %1711 = vrot.lane.b32.xlu0 %v4242_v37, %s3969_s25 }
 0x77f   : > { %1715 = vrot.lane.b32.xlu1 %v4242_v37, %s3968_s22 }
 0x783   : > { %1713 = vrot.lane.b32.xlu1 %v4239_v33, %s3969_s25 }
 0x7a9   : > { %v1487_v36 = vpop.xlane.xlu0 %1486 }
 0x7aa   : > { %3808 = vrcp.f32 %v1487_v36 }
 0x7ad   : > { %v1493_v38 = vpop.xlane.xlu0 %1492 }
 0x7ae   : > { %3810 = vrcp.f32 %v1493_v38  ;;  %v1490_v39 = vpop.xlane.xlu1 %1489 }
 0x7af   : > { %3812 = vrcp.f32 %v1490_v39 }
 0x7b1   : > { %v1522_v40 = vpop.permute.xlu0 %1521 }
 0x7b2   : > { %v1531_v42 = vsel %vm1187_vm8, %v1522_v40, 0  ;;  %v1520_v43 = vpop.permute.xlu1 %1519  ;;  %3636 = vmatprep.subr.msk.bf16.mxu0 %vm1187_vm8, %v1522_v40 }
 0x7b3   : > { %3471 = vmatpush3.bf16.msra.mxu0 %v1531_v42 }
 0x7b4   : > { %3472 = vmatprep.subr.bf16.mxu0 %v1520_v43 }
 0x7b5   : > { %v1582_v54 = vpop.permute.xlu0 %1581 }
 0x7b6   : > { %v1650_v44 = vpop.permute.xlu1 %1649 }
 0x7b7   : > { %3473 = vmatpush3.bf16.msra.mxu0 %v1520_v43  ;;  %v3809_v48 = vpop.eup %3808  ;;  %v1661_v55 = vsel %vm964_vm5, %v1650_v44, 0 }
 0x7b8   : > { %3638 = vmatprep.subr.msk.bf16.mxu0 %vm964_vm5, %v1650_v44  ;;  %v1509_v29 = vmul.f32 %v3809_v48, %v4361_v7 }
 0x7ba   : > { %v1584_v50 = vpop.permute.xlu1 %1583 }
 0x7bb   : > { %v3811_v51 = vpop.eup %3810  ;;  %v1593_v52 = vsel %vm1187_vm8, %v1584_v50, 0  ;;  %3637 = vmatprep.subr.msk.bf16.mxu1 %vm1187_vm8, %v1584_v50 }
 0x7bc   : > { %v3813_v53 = vpop.eup %3812  ;;  %3479 = vmatpush3.bf16.msra.mxu1 %v1593_v52  ;;  %v1511_v57 = vmul.f32 %v3811_v51, %v4365_v10 }
 0x7bd   : > { %3480 = vmatprep.subr.bf16.mxu1 %v1582_v54  ;;  %v1510_v58 = vmul.f32 %v3813_v53, %v4367_v9 }
 0x7be   : > { %v1516_v59 = vpack.c.bf16 %v1511_v57, %v1511_v57  ;;  %v1648_v61 = vpop.permute.xlu1 %1647 }
 0x7bf   : > { %v1515_v60 = vpack.c.bf16 %v1510_v58, %v1509_v29  ;;  %v1658_v62 = vsel %vm964_vm5, %v1648_v61, 0 }
 0x7c0   : > { %3481 = vmatpush3.bf16.msra.mxu1 %v1582_v54 }
 0x7c1   : > { %3474 = vmatprep.mubr.msk.bf16.mxu0 %vm1105_vm7, %v1515_v60 }
 0x7c2   : > { %3475 = vmatmul.mubr.msk.bf16.vlgmr.msra.gmra.mxu0 %vm1105_vm7, %v1516_v59 }
 0x7c3   : > { %3487 = vmatpush3.bf16.xpose.msra.mxu0 %v1661_v55 }
 0x7c4   : > { %3639 = vmatprep.subr.msk.bf16.mxu0 %vm964_vm5, %v1648_v61 }
 0x7cb   : > { %3489 = vmatpush3.bf16.xpose.msra.mxu0 %v1658_v62 }
 0x7e6   : > { %v1499_v63 = vpop.xlane.xlu0 %1498 }
 0x7ea   : > { %v1718_v1 = vpop.permute.xlu0 %1717 }
 0x7eb   : > { %3640 = vmatprep.subr.msk.bf16.mxu1 %vm964_vm5, %v1718_v1  ;;  %v1729_v12 = vsel %vm964_vm5, %v1718_v1, 0 }
 0x7ee   : > { %v1646_v4 = vpop.permute.xlu0 %1645 }
 0x7ef   : > { %v1502_v2 = vpop.xlane.xlu1 %1501 }
 0x7f0   : > { %3814 = vrcp.f32 %v1502_v2 }
 0x7f1   : > { %3816 = vrcp.f32 %v1499_v63 }
 0x7f2   : > { %v1712_v13 = vpop.permute.xlu0 %1711 }
 0x7f3   : > { %v1496_v3 = vpop.xlane.xlu1 %1495 }
 0x7f4   : > { %3818 = vrcp.f32 %v1496_v3 }
 0x7f7   : > { %v1644_v56 = vpop.permute.xlu1 %1643 }
 0x7f8   : > { %3490 = vmatprep.mubr.msk.bf16.mxu0 %vm964_vm5, %v1644_v56 }
 0x7f9   : > { %3491 = vmatmul.mubr.msk.bf16.vlgmr.msra.gmra.mxu0 %vm964_vm5, %v1646_v4 }
 0x7fb   : > { %v1716_v14 = vpop.permute.xlu1 %1715 }
 0x7fc   : > { %v1726_v16 = vsel %vm964_vm5, %v1716_v14, 0 }
 0x7fd   : > { %v3815_v0 = vpop.eup %3814 }
 0x7fe   : > { %v3817_v5 = vpop.eup %3816  ;;  %v1514_v7 = vmul.f32 %v3815_v0, %v4385_v30 }
 0x7ff   : > { %v1513_v10 = vmul.f32 %v3817_v5, %v4381_v27  ;;  %v1714_v17 = vpop.permute.xlu1 %1713 }
 0x800   : > { %v1518_v11 = vpack.c.bf16 %v1514_v7, %v1514_v7 }
 0x801   : > { %v3819_v6 = vpop.eup %3818 }
 0x802   : > { %v1512_v8 = vmul.f32 %v3819_v6, %v4389_v32 }
 0x804   : > { %v1517_v9 = vpack.c.bf16 %v1513_v10, %v1512_v8 }
 0x806   : > { %3482 = vmatprep.mubr.msk.bf16.mxu1 %vm1105_vm7, %v1517_v9 }
 0x807   : > { %3483 = vmatmul.mubr.msk.bf16.vlgmr.msra.gmra.mxu1 %vm1105_vm7, %v1518_v11 }
 0x808   : > { %3495 = vmatpush3.bf16.xpose.msra.mxu1 %v1729_v12  ;;  %3498 = vmatprep.mubr.msk.bf16.mxu1 %vm964_vm5, %v1712_v13 }
 0x809   : > { %3641 = vmatprep.subr.msk.bf16.mxu1 %vm964_vm5, %v1716_v14 }
 0x810   : > { %3497 = vmatpush3.bf16.xpose.msra.mxu1 %v1726_v16 }
 0x817   : > { %3499 = vmatmul.mubr.msk.bf16.vlgmr.msra.gmra.mxu1 %vm964_vm5, %v1714_v17 }
 0x882   : > { %v4427_v19 = vpop.f32.mrf.mxu0 }
 0x884   : > { %v4429_v21 = vpop.f32.mrf.mxu0 }
 0x886   : > { %v3477_v22 = vpop.f32.mrf.mxu0 }
 0x888   : > { %v4431_v23 = vpop.f32.mrf.mxu0 }
 0x889   : > { %v3705_v26 = vpack.i.bf16 %v4431_v23, %v4429_v21 }
 0x8b9   : > { %v3492_v27 = vpop.f32.mrf.mxu0 }
 0x8ba   : > { %v1781_v30 = vmul.f32 0.35355338, %v3492_v27 }
 0x8bb   : > { %v1697_v28 = vpop.f32.mrf.mxu0 }
 0x8bc   : > { %v1779_v31 = vmul.f32 0.35355338, %v1697_v28  ;;  %v1787_v40 = vsel %vm945_vm6, %v1781_v30, -1e+30 }
 0x8bd   : > { %v3493_v32 = vpop.f32.mrf.mxu0  ;;  %v1797_v43 = vsel %vm1105_vm7, %v1787_v40, -inf }
 0x8be   : > { %v1785_v34 = vsel %vm945_vm6, %v1779_v31, -1e+30 }
 0x8bf   : > { %v1700_v36 = vpop.f32.mrf.mxu0  ;;  %v1791_v38 = vsel %vm1105_vm7, %v1785_v34, -inf }
 0x8c0   : > { %v1780_v39 = vmul.f32 0.35355338, %v1700_v36  ;;  %1792 = vmax.xlane.f32.xlu0 %v1791_v38 }
 0x8c2   : > { %v1786_v42 = vsel %vm945_vm6, %v1780_v39, -1e+30 }
 0x8c3   : > { %v1794_v44 = vsel %vm1105_vm7, %v1786_v42, -inf }
 0x8c4   : > { %1798 = vmax.xlane.f32.xlu0 %v1797_v43  ;;  %1795 = vmax.xlane.f32.xlu1 %v1794_v44 }
 0x8c7   : > { %v4444_v48 = vpop.f32.mrf.mxu1 }
 0x8c9   : > { %v4446_v50 = vpop.f32.mrf.mxu1 }
 0x8cb   : > { %v3485_v51 = vpop.f32.mrf.mxu1 }
 0x8cd   : > { %v4448_v52 = vpop.f32.mrf.mxu1 }
 0x8ce   : > { %v3735_v53 = vpack.i.bf16 %v4444_v48, %v4448_v52 }
 0x8d7   : > { %v3500_v54 = vpop.f32.mrf.mxu1 }
 0x8d8   : > { %v1784_v57 = vmul.f32 0.35355338, %v3500_v54 }
 0x8d9   : > { %v1765_v29 = vpop.f32.mrf.mxu1 }
 0x8da   : > { %v1782_v58 = vmul.f32 0.35355338, %v1765_v29  ;;  %v1790_v59 = vsel %vm945_vm6, %v1784_v57, -1e+30 }
 0x8db   : > { %v3501_v60 = vpop.f32.mrf.mxu1  ;;  %v1806_v55 = vsel %vm1105_vm7, %v1790_v59, -inf }
 0x8dc   : > { %1807 = vmax.xlane.f32.xlu1 %v1806_v55  ;;  %v1788_v61 = vsel %vm945_vm6, %v1782_v58, -1e+30 }
 0x8dd   : > { %v1768_v62 = vpop.f32.mrf.mxu1  ;;  %v1800_v63 = vsel %vm1105_vm7, %v1788_v61, -inf }
 0x8de   : > { %v1783_v1 = vmul.f32 0.35355338, %v1768_v62  ;;  %1801 = vmax.xlane.f32.xlu0 %v1800_v63 }
 0x8e0   : > { %v1789_v2 = vsel %vm945_vm6, %v1783_v1, -1e+30 }
 0x8e1   : > { %v1803_v3 = vsel %vm1105_vm7, %v1789_v2, -inf }
 0x8e2   : > { %1804 = vmax.xlane.f32.xlu0 %v1803_v3 }
 0x949   : > { %v1793_v56 = vpop.xlane.xlu0 %1792 }
 0x94a   : > { %v1809_v4 = vsub.f32 %v1785_v34, %v1793_v56 }
 0x94c   : > { %v1815_v0 = vmul.f32 1.442695, %v1809_v4 }
 0x94d   : > { %v1799_v5 = vpop.xlane.xlu0 %1798  ;;  %v1796_v6 = vpop.xlane.xlu1 %1795 }
 0x94e   : > { %3820 = vpow2.f32 %v1815_v0  ;;  %v1811_v7 = vsub.f32 %v1787_v40, %v1799_v5  ;;  %v1810_v8 = vsub.f32 %v1786_v42, %v1796_v6 }
 0x950   : > { %v1819_v10 = vmul.f32 1.442695, %v1811_v7  ;;  %v1817_v9 = vmul.f32 1.442695, %v1810_v8 }
 0x952   : > { %3822 = vpow2.f32 %v1819_v10 }
 0x953   : > { %3824 = vpow2.f32 %v1817_v9 }
 0x95b   : > { %v4461_v11 = vpop.eup %3820 }
 0x95c   : > { %v1827_v12 = vsel %vm1105_vm7, %v4461_v11, 0.0 }
 0x95d   : > { %1828 = vadd.xlane.f32.xlu0 %v1827_v12 }
 0x95f   : > { %v4465_v13 = vpop.eup %3822 }
 0x960   : > { %v4467_v14 = vpop.eup %3824  ;;  %v1833_v16 = vsel %vm1105_vm7, %v4465_v13, 0.0 }
 0x961   : > { %1834 = vadd.xlane.f32.xlu0 %v1833_v16  ;;  %v1830_v17 = vsel %vm1105_vm7, %v4467_v14, 0.0 }
 0x962   : > { %1831 = vadd.xlane.f32.xlu1 %v1830_v17 }
 0x965   : > { %v1808_v31 = vpop.xlane.xlu1 %1807 }
 0x966   : > { %v1814_v32 = vsub.f32 %v1790_v59, %v1808_v31 }
 0x967   : > { %v1802_v22 = vpop.xlane.xlu0 %1801 }
 0x968   : > { %v1825_v34 = vmul.f32 1.442695, %v1814_v32  ;;  %v1812_v36 = vsub.f32 %v1788_v61, %v1802_v22 }
 0x96a   : > { %v1821_v38 = vmul.f32 1.442695, %v1812_v36 }
 0x96b   : > { %v1805_v27 = vpop.xlane.xlu0 %1804 }
 0x96c   : > { %v1813_v28 = vsub.f32 %v1789_v2, %v1805_v27 }
 0x96e   : > { %v1823_v30 = vmul.f32 1.442695, %v1813_v28 }
 0x970   : > { %3826 = vpow2.f32 %v1823_v30 }
 0x971   : > { %3828 = vpow2.f32 %v1825_v34 }
 0x972   : > { %3830 = vpow2.f32 %v1821_v38 }
 0x973   : > { %1861 = vrot.lane.b32.xlu1 %v4231_v15, %s3970_s30 }
 0x977   : > { %1991 = vrot.lane.b32.xlu1 %v4236_v20, %s3971_s17  ;;  %1863 = vrot.lane.b32.xlu0 %v4236_v20, %s3970_s30 }
 0x97b   : > { %1925 = vrot.lane.b32.xlu1 %v4239_v33, %s3970_s30  ;;  %1923 = vrot.lane.b32.xlu0 %v4242_v37, %s3970_s30 }
 0x97d   : > { %v4481_v39 = vpop.eup %3826 }
 0x97e   : > { %v1839_v40 = vsel %vm1105_vm7, %v4481_v39, 0.0  ;;  %v4485_v42 = vpop.eup %3828 }
 0x97f   : > { %1989 = vrot.lane.b32.xlu1 %v4231_v15, %s3971_s17  ;;  %v1842_v43 = vsel %vm1105_vm7, %v4485_v42, 0.0  ;;  %v4489_v44 = vpop.eup %3830 }
 0x980   : > { %v1836_v51 = vsel %vm1105_vm7, %v4489_v44, 0.0 }
 0x99a   : > { %1840 = vadd.xlane.f32.xlu0 %v1839_v40 }
 0x9a3   : > { %1843 = vadd.xlane.f32.xlu1 %v1842_v43 }
 0x9a7   : > { %1837 = vadd.xlane.f32.xlu1 %v1836_v51 }
 0x9b0   : > { %2059 = vrot.lane.b32.xlu0 %v4239_v33, %s3971_s17 }
 0x9b4   : > { %1987 = vrot.lane.b32.xlu0 %v4236_v20, %s3972_s13 }
 0x9b8   : > { %1985 = vrot.lane.b32.xlu1 %v4231_v15, %s3972_s13  ;;  %2053 = vrot.lane.b32.xlu0 %v4242_v37, %s3972_s13 }
 0x9bc   : > { %2057 = vrot.lane.b32.xlu1 %v4242_v37, %s3971_s17 }
 0x9c0   : > { %2055 = vrot.lane.b32.xlu1 %v4239_v33, %s3972_s13 }
 0x9e6   : > { %v1829_v54 = vpop.xlane.xlu0 %1828 }
 0x9e7   : > { %3832 = vrcp.f32 %v1829_v54 }
 0x9ea   : > { %v1835_v57 = vpop.xlane.xlu0 %1834 }
 0x9eb   : > { %3834 = vrcp.f32 %v1835_v57  ;;  %v1832_v29 = vpop.xlane.xlu1 %1831 }
 0x9ec   : > { %3836 = vrcp.f32 %v1832_v29 }
 0x9ee   : > { %v1864_v58 = vpop.permute.xlu0 %1863 }
 0x9ef   : > { %v1873_v59 = vsel %vm1187_vm8, %v1864_v58, 0  ;;  %v1862_v60 = vpop.permute.xlu1 %1861  ;;  %3642 = vmatprep.subr.msk.bf16.mxu0 %vm1187_vm8, %v1864_v58 }
 0x9f0   : > { %3503 = vmatpush3.bf16.msra.mxu0 %v1873_v59 }
 0x9f1   : > { %3504 = vmatprep.subr.bf16.mxu0 %v1862_v60 }
 0x9f2   : > { %v1924_v3 = vpop.permute.xlu0 %1923 }
 0x9f3   : > { %v1992_v55 = vpop.permute.xlu1 %1991 }
 0x9f4   : > { %3505 = vmatpush3.bf16.msra.mxu0 %v1862_v60  ;;  %v3833_v61 = vpop.eup %3832  ;;  %v2003_v7 = vsel %vm964_vm5, %v1992_v55, 0 }
 0x9f5   : > { %3644 = vmatprep.subr.msk.bf16.mxu0 %vm964_vm5, %v1992_v55  ;;  %v1851_v4 = vmul.f32 %v3833_v61, %v4461_v11 }
 0x9f7   : > { %v1926_v62 = vpop.permute.xlu1 %1925 }
 0x9f8   : > { %v3835_v63 = vpop.eup %3834  ;;  %v1935_v1 = vsel %vm1187_vm8, %v1926_v62, 0  ;;  %3643 = vmatprep.subr.msk.bf16.mxu1 %vm1187_vm8, %v1926_v62 }
 0x9f9   : > { %v3837_v2 = vpop.eup %3836  ;;  %3511 = vmatpush3.bf16.msra.mxu1 %v1935_v1  ;;  %v1853_v56 = vmul.f32 %v3835_v63, %v4465_v13 }
 0x9fa   : > { %3512 = vmatprep.subr.bf16.mxu1 %v1924_v3  ;;  %v1852_v0 = vmul.f32 %v3837_v2, %v4467_v14 }
 0x9fb   : > { %v1858_v5 = vpack.c.bf16 %v1853_v56, %v1853_v56  ;;  %v1990_v8 = vpop.permute.xlu1 %1989 }
 0x9fc   : > { %v1857_v6 = vpack.c.bf16 %v1852_v0, %v1851_v4  ;;  %v2000_v10 = vsel %vm964_vm5, %v1990_v8, 0 }
 0x9fd   : > { %3513 = vmatpush3.bf16.msra.mxu1 %v1924_v3 }
 0x9fe   : > { %3506 = vmatprep.mubr.msk.bf16.mxu0 %vm1105_vm7, %v1857_v6 }
 0x9ff   : > { %3507 = vmatmul.mubr.msk.bf16.vlgmr.msra.gmra.mxu0 %vm1105_vm7, %v1858_v5 }
 0xa00   : > { %3519 = vmatpush3.bf16.xpose.msra.mxu0 %v2003_v7 }
 0xa01   : > { %3645 = vmatprep.subr.msk.bf16.mxu0 %vm964_vm5, %v1990_v8 }
 0xa08   : > { %3521 = vmatpush3.bf16.xpose.msra.mxu0 %v2000_v10 }
 0xa23   : > { %v1841_v9 = vpop.xlane.xlu0 %1840 }
 0xa27   : > { %v2060_v11 = vpop.permute.xlu0 %2059 }
 0xa28   : > { %3646 = vmatprep.subr.msk.bf16.mxu1 %vm964_vm5, %v2060_v11  ;;  %v2071_v36 = vsel %vm964_vm5, %v2060_v11, 0 }
 0xa2b   : > { %v1988_v16 = vpop.permute.xlu0 %1987 }
 0xa2c   : > { %v1844_v12 = vpop.xlane.xlu1 %1843 }
 0xa2d   : > { %3838 = vrcp.f32 %v1844_v12 }
 0xa2e   : > { %3840 = vrcp.f32 %v1841_v9 }
 0xa2f   : > { %v2054_v38 = vpop.permute.xlu0 %2053 }
 0xa30   : > { %v1838_v13 = vpop.xlane.xlu1 %1837 }
 0xa31   : > { %3842 = vrcp.f32 %v1838_v13 }
 0xa34   : > { %v1986_v14 = vpop.permute.xlu1 %1985 }
 0xa35   : > { %3522 = vmatprep.mubr.msk.bf16.mxu0 %vm964_vm5, %v1986_v14 }
 0xa36   : > { %3523 = vmatmul.mubr.msk.bf16.vlgmr.msra.gmra.mxu0 %vm964_vm5, %v1988_v16 }
 0xa38   : > { %v2058_v40 = vpop.permute.xlu1 %2057 }
 0xa3a   : > { %v3839_v17 = vpop.eup %3838 }
 0xa3b   : > { %v3841_v22 = vpop.eup %3840  ;;  %v1856_v28 = vmul.f32 %v3839_v17, %v4485_v42  ;;  %v2068_v42 = vsel %vm964_vm5, %v2058_v40, 0 }
 0xa3c   : > { %v1855_v31 = vmul.f32 %v3841_v22, %v4481_v39  ;;  %v2056_v43 = vpop.permute.xlu1 %2055 }
 0xa3d   : > { %v1860_v34 = vpack.c.bf16 %v1856_v28, %v1856_v28 }
 0xa3e   : > { %v3843_v27 = vpop.eup %3842 }
 0xa3f   : > { %v1854_v30 = vmul.f32 %v3843_v27, %v4489_v44 }
 0xa41   : > { %v1859_v32 = vpack.c.bf16 %v1855_v31, %v1854_v30 }
 0xa43   : > { %3514 = vmatprep.mubr.msk.bf16.mxu1 %vm1105_vm7, %v1859_v32 }
 0xa44   : > { %3515 = vmatmul.mubr.msk.bf16.vlgmr.msra.gmra.mxu1 %vm1105_vm7, %v1860_v34 }
 0xa45   : > { %3527 = vmatpush3.bf16.xpose.msra.mxu1 %v2071_v36  ;;  %3530 = vmatprep.mubr.msk.bf16.mxu1 %vm964_vm5, %v2054_v38 }
 0xa46   : > { %3647 = vmatprep.subr.msk.bf16.mxu1 %vm964_vm5, %v2058_v40 }
 0xa4d   : > { %3529 = vmatpush3.bf16.xpose.msra.mxu1 %v2068_v42 }
 0xa54   : > { %3531 = vmatmul.mubr.msk.bf16.vlgmr.msra.gmra.mxu1 %vm964_vm5, %v2056_v43 }
 0xabf   : > { %v4527_v39 = vpop.f32.mrf.mxu0 }
 0xac1   : > { %v4529_v44 = vpop.f32.mrf.mxu0 }
 0xac3   : > { %v3509_v51 = vpop.f32.mrf.mxu0 }
 0xac5   : > { %v4531_v54 = vpop.f32.mrf.mxu0 }
 0xac6   : > { %v3710_v57 = vpack.i.bf16 %v4531_v54, %v4529_v44 }
 0xaf6   : > { %v3524_v29 = vpop.f32.mrf.mxu0 }
 0xaf7   : > { %v2123_v59 = vmul.f32 0.35355338, %v3524_v29 }
 0xaf8   : > { %v2039_v58 = vpop.f32.mrf.mxu0 }
 0xaf9   : > { %v2121_v60 = vmul.f32 0.35355338, %v2039_v58  ;;  %v2129_v2 = vsel %vm945_vm6, %v2123_v59, -1e+30 }
 0xafa   : > { %v3525_v55 = vpop.f32.mrf.mxu0  ;;  %v2139_v56 = vsel %vm1105_vm7, %v2129_v2, -inf }
 0xafb   : > { %v2127_v61 = vsel %vm945_vm6, %v2121_v60, -1e+30 }
 0xafc   : > { %v2042_v62 = vpop.f32.mrf.mxu0  ;;  %v2133_v63 = vsel %vm1105_vm7, %v2127_v61, -inf }
 0xafd   : > { %v2122_v1 = vmul.f32 0.35355338, %v2042_v62  ;;  %2134 = vmax.xlane.f32.xlu0 %v2133_v63 }
 0xaff   : > { %v2128_v3 = vsel %vm945_vm6, %v2122_v1, -1e+30 }
 0xb00   : > { %v2136_v4 = vsel %vm1105_vm7, %v2128_v3, -inf }
 0xb01   : > { %2140 = vmax.xlane.f32.xlu0 %v2139_v56  ;;  %2137 = vmax.xlane.f32.xlu1 %v2136_v4 }
 0xb04   : > { %v4544_v0 = vpop.f32.mrf.mxu1 }
 0xb06   : > { %v4546_v5 = vpop.f32.mrf.mxu1 }
 0xb08   : > { %v3517_v6 = vpop.f32.mrf.mxu1 }
 0xb0a   : > { %v4548_v7 = vpop.f32.mrf.mxu1 }
 0xb0b   : > { %v3740_v8 = vpack.i.bf16 %v4544_v0, %v4548_v7 }
 0xb14   : > { %v3532_v10 = vpop.f32.mrf.mxu1 }
 0xb15   : > { %v2126_v9 = vmul.f32 0.35355338, %v3532_v10 }
 0xb16   : > { %v2107_v11 = vpop.f32.mrf.mxu1 }
 0xb17   : > { %v2124_v12 = vmul.f32 0.35355338, %v2107_v11  ;;  %v2132_v13 = vsel %vm945_vm6, %v2126_v9, -1e+30 }
 0xb18   : > { %v3533_v14 = vpop.f32.mrf.mxu1  ;;  %v2148_v16 = vsel %vm1105_vm7, %v2132_v13, -inf }
 0xb19   : > { %2149 = vmax.xlane.f32.xlu1 %v2148_v16  ;;  %v2130_v17 = vsel %vm945_vm6, %v2124_v12, -1e+30 }
 0xb1a   : > { %v2110_v22 = vpop.f32.mrf.mxu1  ;;  %v2142_v27 = vsel %vm1105_vm7, %v2130_v17, -inf }
 0xb1b   : > { %v2125_v28 = vmul.f32 0.35355338, %v2110_v22  ;;  %2143 = vmax.xlane.f32.xlu0 %v2142_v27 }
 0xb1d   : > { %v2131_v30 = vsel %vm945_vm6, %v2125_v28, -1e+30 }
 0xb1e   : > { %v2145_v31 = vsel %vm1105_vm7, %v2131_v30, -inf }
 0xb1f   : > { %2146 = vmax.xlane.f32.xlu0 %v2145_v31 }
 0xb86   : > { %v2135_v32 = vpop.xlane.xlu0 %2134 }
 0xb87   : > { %v2151_v34 = vsub.f32 %v2127_v61, %v2135_v32 }
 0xb89   : > { %v2157_v36 = vmul.f32 1.442695, %v2151_v34 }
 0xb8a   : > { %v2141_v38 = vpop.xlane.xlu0 %2140  ;;  %v2138_v40 = vpop.xlane.xlu1 %2137 }
 0xb8b   : > { %3844 = vpow2.f32 %v2157_v36  ;;  %v2153_v42 = vsub.f32 %v2129_v2, %v2141_v38  ;;  %v2152_v43 = vsub.f32 %v2128_v3, %v2138_v40 }
 0xb8d   : > { %v2161_v51 = vmul.f32 1.442695, %v2153_v42  ;;  %v2159_v29 = vmul.f32 1.442695, %v2152_v43 }
 0xb8f   : > { %3846 = vpow2.f32 %v2161_v51 }
 0xb90   : > { %3848 = vpow2.f32 %v2159_v29 }
 0xb98   : > { %v3845_v58 = vpop.eup %3844 }
 0xb99   : > { %v2169_v59 = vsel %vm1105_vm7, %v3845_v58, 0.0 }
 0xb9a   : > { %2170 = vadd.xlane.f32.xlu0 %v2169_v59 }
 0xb9c   : > { %v4562_v46 = vpop.eup %3846 }
 0xb9d   : > { %v3849_v60 = vpop.eup %3848  ;;  %v2175_v55 = vsel %vm1105_vm7, %v4562_v46, 0.0 }
 0xb9e   : > { %2176 = vadd.xlane.f32.xlu0 %v2175_v55  ;;  %v2172_v61 = vsel %vm1105_vm7, %v3849_v60, 0.0 }
 0xb9f   : > { %2173 = vadd.xlane.f32.xlu1 %v2172_v61 }
 0xba2   : > { %v2150_v62 = vpop.xlane.xlu1 %2149 }
 0xba3   : > { %v2156_v63 = vsub.f32 %v2132_v13, %v2150_v62 }
 0xba4   : > { %v2144_v1 = vpop.xlane.xlu0 %2143 }
 0xba5   : > { %v2167_v2 = vmul.f32 1.442695, %v2156_v63  ;;  %v2154_v3 = vsub.f32 %v2130_v17, %v2144_v1 }
 0xba7   : > { %3850 = vpow2.f32 %v2167_v2  ;;  %v2163_v56 = vmul.f32 1.442695, %v2154_v3 }
 0xba8   : > { %v2147_v4 = vpop.xlane.xlu0 %2146 }
 0xba9   : > { %3852 = vpow2.f32 %v2163_v56  ;;  %v2155_v6 = vsub.f32 %v2131_v30, %v2147_v4  ;;  %v3725_v4 = vpack.i.bf16 %v4546_v5, %v4527_v39 }
 0xbab   : > { %v2165_v10 = vmul.f32 1.442695, %v2155_v6 }
 0xbad   : > { %3854 = vpow2.f32 %v2165_v10 }
 0xbb4   : > { %v3851_v9 = vpop.eup %3850 }
 0xbb5   : > { %v2184_v11 = vsel %vm1105_vm7, %v3851_v9, 0.0 }
 0xbb6   : > { %v3853_v12 = vpop.eup %3852  ;;  %2185 = vadd.xlane.f32.xlu1 %v2184_v11 }
 0xbb7   : > { %v2178_v14 = vsel %vm1105_vm7, %v3853_v12, 0.0 }
 0xbba   : > { %v3855_v16 = vpop.eup %3854  ;;  %2179 = vadd.xlane.f32.xlu1 %v2178_v14 }
 0xbbb   : > { %v2181_v13 = vsel %vm1105_vm7, %v3855_v16, 0.0 }
 0xbbc   : > { %2182 = vadd.xlane.f32.xlu0 %v2181_v13 }
 0xbcb   : > { %2203 = vrot.lane.b32.xlu1 %v4231_v15, %s3973_s15  ;;  %v3720_v15 = vpack.i.bf16 %v4446_v50, %v4427_v19 }
 0xbcf   : > { %2267 = vrot.lane.b32.xlu1 %v4239_v33, %s3973_s15 }
 0xbd2   : > { %2205 = vrot.lane.b32.xlu0 %v4236_v20, %s3973_s15 }
 0xbd3   : > { %2265 = vrot.lane.b32.xlu1 %v4242_v37, %s3973_s15 }
 0xbd6   : > { %3706 = vrot.lane.b32.xlu0 %v3705_v26, %s3974_s26 }
 0xbd7   : > { %3711 = vrot.lane.b32.xlu1 %v3710_v57, %s3975_s3 }
 0xbdb   : > { %3721 = vrot.lane.b32.xlu1 %v3720_v15, %s3974_s26 }
 0xc23   : > { %v2171_v20 = vpop.xlane.xlu0 %2170 }
 0xc24   : > { %3856 = vrcp.f32 %v2171_v20 }
 0xc27   : > { %v2177_v23 = vpop.xlane.xlu0 %2176 }
 0xc28   : > { %v2174_v33 = vpop.xlane.xlu1 %2173 }
 0xc29   : > { %3858 = vrcp.f32 %v2174_v33 }
 0xc2a   : > { %3860 = vrcp.f32 %v2177_v23 }
 0xc31   : > { %v3857_v37 = vpop.eup %3856 }
 0xc32   : > { %v2193_v22 = vmul.f32 %v3857_v37, %v3845_v58 }
 0xc36   : > { %v3859_v17 = vpop.eup %3858 }
 0xc37   : > { %v2194_v21 = vmul.f32 %v3859_v17, %v3849_v60  ;;  %v3861_v57 = vpop.eup %3860  ;;  %v3753_v60 = vld [vmem:[%s4099_s14] sm:$0xff]  }
 0xc38   : > { %v2195_v32 = vmul.f32 %v3861_v57, %v4562_v46  ;;  %v3752_v46 = vld [vmem:[%s4099_s14 + $0x8] sm:$0xff]  }
 0xc39   : > { %v2199_v26 = vpack.c.bf16 %v2194_v21, %v2193_v22 }
 0xc3a   : > { %v2200_v38 = vpack.c.bf16 %v2195_v32, %v2195_v32 }
 0xc3b   : > { %3538 = vmatprep.mubr.msk.bf16.mxu0 %vm1105_vm7, %v2199_v26 }
 0xc3f   : > { %v2186_v44 = vpop.xlane.xlu1 %2185 }
 0xc40   : > { %3862 = vrcp.f32 %v2186_v44 }
 0xc43   : > { %v2180_v54 = vpop.xlane.xlu1 %2179 }
 0xc44   : > { %3864 = vrcp.f32 %v2180_v54 }
 0xc45   : > { %v2183_v19 = vpop.xlane.xlu0 %2182 }
 0xc46   : > { %3866 = vrcp.f32 %v2183_v19 }
 0xc47   : > { %v2204_v50 = vpop.permute.xlu1 %2203 }
 0xc49   : > { %v2206_v27 = vpop.permute.xlu0 %2205 }
 0xc4a   : > { %v2215_v28 = vsel %vm1187_vm8, %v2206_v27, 0  ;;  %3648 = vmatprep.subr.msk.bf16.mxu0 %vm1187_vm8, %v2206_v27 }
 0xc4b   : > { %3535 = vmatpush3.bf16.msra.mxu0 %v2215_v28  ;;  %v2268_v30 = vpop.permute.xlu1 %2267 }
 0xc4c   : > { %v2277_v31 = vsel %vm1187_vm8, %v2268_v30, 0  ;;  %3536 = vmatprep.subr.bf16.mxu0 %v2204_v50  ;;  %3649 = vmatprep.subr.msk.bf16.mxu1 %vm1187_vm8, %v2268_v30 }
 0xc4d   : > { %3543 = vmatpush3.bf16.msra.mxu1 %v2277_v31  ;;  %v3863_v36 = vpop.eup %3862 }
 0xc4e   : > { %v2198_v43 = vmul.f32 %v3863_v36, %v3851_v9 }
 0xc4f   : > { %3537 = vmatpush3.bf16.msra.mxu0 %v2204_v50  ;;  %v2266_v34 = vpop.permute.xlu1 %2265 }
 0xc50   : > { %3544 = vmatprep.subr.bf16.mxu1 %v2266_v34  ;;  %3550 = vmatprep.subr.bf16.mxu0 %v3961_v18  ;;  %v2202_v59 = vpack.c.bf16 %v2198_v43, %v2198_v43 }
 0xc51   : > { %v3865_v40 = vpop.eup %3864  ;;  %3545 = vmatpush3.bf16.msra.mxu1 %v2266_v34 }
 0xc52   : > { %3539 = vmatmul.mubr.msk.bf16.vlgmr.msra.gmra.mxu0 %vm1105_vm7, %v2200_v38  ;;  %3566 = vmatprep.subr.bf16.mxu1 %v3961_v18  ;;  %v2196_v51 = vmul.f32 %v3865_v40, %v3853_v12  ;;  %v3707_v12 = vpop.permute.xlu0 %3706 }
 0xc53   : > { %v3867_v42 = vpop.eup %3866  ;;  %3554 = vmatprep.mubr.msk.bf16.mxu0 %vm3962_vm4, %v3961_v18  ;;  %3551 = vmatpush3.bf16.msra.mxu0 %v3752_v46  ;;  %v3712_v11 = vpop.permute.xlu1 %3711  ;;  %v3709_v39 = vunpack.i.h.bf16 %v3707_v12  ;;  %v3708_v5 = vunpack.i.l.bf16 %v3707_v12 }
 0xc54   : > { %v2197_v29 = vmul.f32 %v3867_v42, %v3855_v16  ;;  %3552 = vmatprep.subr.bf16.mxu0 %v3961_v18  ;;  %v3714_v14 = vunpack.i.h.bf16 %v3712_v11  ;;  %v3713_v16 = vunpack.i.l.bf16 %v3712_v11 }
 0xc55   : > { %v2400_v0 = vsel %vm964_vm5, %v4340_v41, %v3709_v39  ;;  %v2399_v7 = vsel %vm964_vm5, %v4333_v25, %v3708_v5 }
 0xc56   : > { %v2201_v58 = vpack.c.bf16 %v2197_v29, %v2196_v51  ;;  %v2407_v52 = vsel %vm2405_vm9, %v2400_v0, %v3714_v14  ;;  %v3895_v14 = vld [vmem:[#allocation2 + $0x10] sm:$0xff] }
 0xc57   : > { %3553 = vmatpush3.bf16.msra.mxu0 %v3753_v60  ;;  %v3722_v13 = vpop.permute.xlu1 %3721  ;;  %v4650_v60 = vld [vmem:[%s4085_s23] sm:$0x3f] }
 0xc58   : > { %3546 = vmatprep.mubr.msk.bf16.mxu1 %vm1105_vm7, %v2201_v58  ;;  %3582 = vmatprep.subr.bf16.mxu0 %v3961_v18  ;;  %v3724_v20 = vunpack.i.h.bf16 %v3722_v13  ;;  %v3723_v33 = vunpack.i.l.bf16 %v3722_v13 }
 0xc59   : > { %3547 = vmatmul.mubr.msk.bf16.vlgmr.msra.gmra.mxu1 %vm1105_vm7, %v2202_v59 }
 0xc5a   : > { %3570 = vmatprep.mubr.msk.bf16.mxu1 %vm3962_vm4, %v3961_v18  ;;  %v2402_v25 = vsel %vm964_vm5, %v4348_v47, %v3724_v20  ;;  %v2401_v44 = vsel %vm964_vm5, %v4331_v24, %v3723_v33 }
 0xd12   : > { %v3540_v55 = vpop.f32.mrf.mxu0 }
 0xd14   : > { %v2251_v61 = vpop.f32.mrf.mxu0 }
 0xd16   : > { %v3541_v62 = vpop.f32.mrf.mxu0 }
 0xd18   : > { %v2254_v63 = vpop.f32.mrf.mxu0 }
 0xd19   : > { %v3715_v1 = vpack.i.bf16 %v2254_v63, %v2251_v61  ;;  %v3548_v2 = vpop.f32.mrf.mxu1 }
 0xd1b   : > { %3716 = vrot.lane.b32.xlu0 %v3715_v1, %s3976_s4  ;;  %v2313_v3 = vpop.f32.mrf.mxu1  ;;  %v3893_v1 = vld [vmem:[#allocation2] sm:$0xff] }
 0xd1c   : > { %v3730_v56 = vpack.i.bf16 %v2313_v3, %v3540_v55 }
 0xd1d   : > { %v3549_v6 = vpop.f32.mrf.mxu1 }
 0xd1e   : > { %3731 = vrot.lane.b32.xlu1 %v3730_v56, %s3976_s4 }
 0xd1f   : > { %3726 = vrot.lane.b32.xlu0 %v3725_v4, %s3975_s3  ;;  %v2316_v10 = vpop.f32.mrf.mxu1 }
 0xd20   : > { %v3745_v9 = vpack.i.bf16 %v3548_v2, %v2316_v10  ;;  %v3894_v10 = vld [vmem:[#allocation2 + $0x8] sm:$0xff] }
 0xd22   : > { %3741 = vrot.lane.b32.xlu1 %v3740_v8, %s3975_s3  ;;  %s4840_s3 = sld [smem:[#allocation11_spill]] (!%p3265_p6) }
 0xd23   : > { %3736 = vrot.lane.b32.xlu0 %v3735_v53, %s3974_s26  ;;  %v2406_v53 = vsel %vm2405_vm9, %v2399_v7, %v3713_v16 }
 0xd27   : > { %3746 = vrot.lane.b32.xlu0 %v3745_v9, %s3976_s4 }
 0xd8d   : > { %v3717_v15 = vpop.permute.xlu0 %3716 }
 0xd8e   : > { %v3719_v8 = vunpack.i.h.bf16 %v3717_v15  ;;  %v3718_v48 = vunpack.i.l.bf16 %v3717_v15 }
 0xd90   : > { %v2412_v37 = vsel %vm1105_vm7, %v2406_v53, %v3718_v48  ;;  %v2413_v17 = vsel %vm1105_vm7, %v2407_v52, %v3719_v8  ;;  %v3732_v21 = vpop.permute.xlu1 %3731  ;;  %v3896_v8 = vld [vmem:[#allocation2 + $0x18] sm:$0xff] }
 0xd91   : > { %v2418_v22 = vpack.c.bf16 %v2413_v17, %v2412_v37  ;;  %v3727_v23 = vpop.permute.xlu0 %3726  ;;  %v3734_v54 = vunpack.i.h.bf16 %v3732_v21  ;;  %v3733_v19 = vunpack.i.l.bf16 %v3732_v21  ;;  %v3897_v37 = vld [vmem:[#allocation2 + $0x20] sm:$0xff] }
 0xd92   : > { %v3729_v26 = vunpack.i.h.bf16 %v3727_v23  ;;  %v3728_v41 = vunpack.i.l.bf16 %v3727_v23 }
 0xd93   : > { %3555 = vmatmul.mubr.msk.bf16.vlgmr.msra.gmra.mxu0 %vm751_vm3, %v2418_v22 }
 0xd94   : > { %v2408_v50 = vsel %vm2405_vm9, %v2401_v44, %v3728_v41  ;;  %v2409_v57 = vsel %vm2405_vm9, %v2402_v25, %v3729_v26  ;;  %3558 = vmatprep.mubr.msk.bf16.mxu0 %vm3962_vm4, %v3961_v18  ;;  %v3742_v32 = vpop.permute.xlu1 %3741  ;;  %v3898_v41 = vld [vmem:[#allocation2 + $0x28] sm:$0xff] }
 0xd95   : > { %v3737_v27 = vpop.permute.xlu0 %3736  ;;  %v2414_v31 = vsel %vm1105_vm7, %v2408_v50, %v3733_v19  ;;  %v2415_v47 = vsel %vm1105_vm7, %v2409_v57, %v3734_v54  ;;  %v3744_v43 = vunpack.i.h.bf16 %v3742_v32  ;;  %v3743_v51 = vunpack.i.l.bf16 %v3742_v32 }
 0xd96   : > { %v3739_v28 = vunpack.i.h.bf16 %v3737_v27  ;;  %v3738_v30 = vunpack.i.l.bf16 %v3737_v27  ;;  %v2419_v34 = vpack.c.bf16 %v2415_v47, %v2414_v31 }
 0xd98   : > { %v2404_v36 = vsel %vm964_vm5, %v4346_v45, %v3739_v28  ;;  %v2403_v38 = vsel %vm964_vm5, %v4350_v49, %v3738_v30  ;;  %v2427_v49 = vsub.s32 4, %v4208_v35 }
 0xd99   : > { %v3747_v24 = vpop.permute.xlu0 %3746  ;;  %v2410_v29 = vsel %vm2405_vm9, %v2403_v38, %v3743_v51  ;;  %v2411_v58 = vsel %vm2405_vm9, %v2404_v36, %v3744_v43 }
 0xd9a   : > { %v3749_v40 = vunpack.i.h.bf16 %v3747_v24  ;;  %v3748_v42 = vunpack.i.l.bf16 %v3747_v24  ;;  %v2428_v55 = vrot.slane %v4650_v60, %v2427_v49 }
 0xd9b   : > { %3559 = vmatmul.mubr.msk.bf16.gmra.mxu0 %vm751_vm3, %v2419_v34 }
 0xd9c   : > { %3562 = vmatprep.mubr.msk.bf16.mxu0 %vm3962_vm4, %v3961_v18  ;;  %v2416_v59 = vsel %vm1105_vm7, %v2410_v29, %v3748_v42  ;;  %v2417_v45 = vsel %vm1105_vm7, %v2411_v58, %v3749_v40 }
 0xd9d   : > { %v2420_v46 = vpack.c.bf16 %v2417_v45, %v2416_v59 }
 0xda3   : > { %3563 = vmatmul.mubr.msk.bf16.gmra.mxu0 %vm751_vm3, %v2420_v46 }
 0xda4   : > { %3590 = vmatprep.mubr.msk.bf16.mxu0 %vm3962_vm4, %v3961_v18 }
 0xe53   : > { %v2484_v61 = vpop.f32.mrf.mxu0 }
 0xe54   : > { %v2485_v62 = vadd.f32 %v2484_v61, %v2428_v55 }
 0xe55   : > { %v3556_v63 = vpop.f32.mrf.mxu0 }
 0xe56   : > { %v4653_v2 = vadd.f32 %v3893_v1, %v2485_v62 }
 0xe57   : > { %v2487_v3 = vpop.f32.mrf.mxu0 }
 0xe58   : > { %v2488_v56 = vadd.f32 %v2487_v3, %v2428_v55  ;;  %v2513_v4 = vsel %vm751_vm3, %v4653_v2, 0.0 }
 0xe59   : > { %2514 = vadd.xlane.f32.xlu1 %v2513_v4  ;;  %v3557_v6 = vpop.f32.mrf.mxu0  ;;  %v3755_v4 = vld [vmem:[%s4104_s21] sm:$0xff]  }
 0xe5a   : > { %v4657_v9 = vadd.f32 %v3894_v10, %v2488_v56  ;;  %v3754_v56 = vld [vmem:[%s4104_s21 + $0x8] sm:$0xff]  }
 0xe5b   : > { %v2492_v11 = vpop.f32.mrf.mxu0  ;;  %3567 = vmatpush3.bf16.msra.mxu1 %v3754_v56  ;;  %v3252_v56 = vld [vmem:[%s595_s24] ss:$0 sm:$0xff] }
 0xe5c   : > { %v2493_v12 = vadd.f32 %v2492_v11, %v2428_v55  ;;  %v2516_v39 = vsel %vm751_vm3, %v4657_v9, 0.0  ;;  %3568 = vmatprep.subr.bf16.mxu1 %v3961_v18 }
 0xe5d   : > { %2517 = vadd.xlane.f32.xlu0 %v2516_v39  ;;  %v3560_v5 = vpop.f32.mrf.mxu0 }
 0xe5e   : > { %v4661_v16 = vadd.f32 %v3895_v14, %v2493_v12 }
 0xe5f   : > { %v2495_v13 = vpop.f32.mrf.mxu0  ;;  %3569 = vmatpush3.bf16.msra.mxu1 %v3755_v4 }
 0xe60   : > { %v2496_v15 = vadd.f32 %v2495_v13, %v2428_v55  ;;  %v2519_v0 = vsel %vm751_vm3, %v4661_v16, 0.0 }
 0xe61   : > { %2520 = vadd.xlane.f32.xlu0 %v2519_v0  ;;  %v3561_v7 = vpop.f32.mrf.mxu0 }
 0xe62   : > { %v4665_v48 = vadd.f32 %v3896_v8, %v2496_v15 }
 0xe63   : > { %v2500_v52 = vpop.f32.mrf.mxu0 }
 0xe64   : > { %v2501_v53 = vadd.f32 %v2500_v52, %v2428_v55  ;;  %v2522_v20 = vsel %vm751_vm3, %v4665_v48, 0.0  ;;  %v2593_v52 = vsub.s32 2, %v4208_v35 }
 0xe65   : > { %2523 = vadd.xlane.f32.xlu0 %v2522_v20  ;;  %v3564_v33 = vpop.f32.mrf.mxu0 }
 0xe66   : > { %v4669_v17 = vadd.f32 %v3897_v37, %v2501_v53 }
 0xe67   : > { %v2503_v22 = vpop.f32.mrf.mxu0 }
 0xe68   : > { %v2504_v21 = vadd.f32 %v2503_v22, %v2428_v55  ;;  %v2525_v23 = vsel %vm751_vm3, %v4669_v17, 0.0 }
 0xe69   : > { %2526 = vadd.xlane.f32.xlu1 %v2525_v23  ;;  %v3565_v26 = vpop.f32.mrf.mxu0  ;;  %v2603_v23 = vsub.s32 3, %v4208_v35 }
 0xe6a   : > { %v4673_v25 = vadd.f32 %v3898_v41, %v2504_v21  ;;  %v2594_v21 = vrot.slane %v4650_v60, %v2593_v52 }
 0xe6c   : > { %v2528_v44 = vsel %vm751_vm3, %v4673_v25, 0.0 }
 0xe6d   : > { %2529 = vadd.xlane.f32.xlu0 %v2528_v44 }
 0xee2   : > { %v2515_v54 = vpop.xlane.xlu1 %2514 }
 0xee3   : > { %v2531_v19 = vmul.f32 0.03125, %v2515_v54 }
 0xee5   : > { %v2537_v50 = vsub.f32 %v4653_v2, %v2531_v19 }
 0xee6   : > { %v2518_v57 = vpop.xlane.xlu0 %2517 }
 0xee7   : > { %v2532_v27 = vmul.f32 0.03125, %v2518_v57  ;;  %v2543_v28 = vmul.f32 %v2537_v50, %v2537_v50 }
 0xee9   : > { %v4679_v30 = vsub.f32 %v4657_v9, %v2532_v27  ;;  %v2549_v31 = vsel %vm751_vm3, %v2543_v28, 0.0  ;;  %v2604_v27 = vrot.slane %v4650_v60, %v2603_v23 }
 0xeea   : > { %v2521_v47 = vpop.xlane.xlu0 %2520  ;;  %2550 = vadd.xlane.f32.xlu1 %v2549_v31 }
 0xeeb   : > { %v2533_v32 = vmul.f32 0.03125, %v2521_v47  ;;  %v2544_v24 = vmul.f32 %v4679_v30, %v4679_v30 }
 0xeed   : > { %v4685_v34 = vsub.f32 %v4661_v16, %v2533_v32  ;;  %v2552_v36 = vsel %vm751_vm3, %v2544_v24, 0.0 }
 0xeee   : > { %v2524_v38 = vpop.xlane.xlu0 %2523  ;;  %2553 = vadd.xlane.f32.xlu0 %v2552_v36 }
 0xeef   : > { %v2534_v40 = vmul.f32 0.03125, %v2524_v38  ;;  %v2545_v42 = vmul.f32 %v4685_v34, %v4685_v34 }
 0xef1   : > { %v4691_v43 = vsub.f32 %v4665_v48, %v2534_v40  ;;  %v2555_v51 = vsel %vm751_vm3, %v2545_v42, 0.0 }
 0xef2   : > { %2556 = vadd.xlane.f32.xlu1 %v2555_v51  ;;  %v2527_v29 = vpop.xlane.xlu1 %2526 }
 0xef3   : > { %v2535_v58 = vmul.f32 0.03125, %v2527_v29  ;;  %v2546_v59 = vmul.f32 %v4691_v43, %v4691_v43 }
 0xef5   : > { %v4697_v45 = vsub.f32 %v4669_v17, %v2535_v58  ;;  %v2558_v46 = vsel %vm751_vm3, %v2546_v59, 0.0 }
 0xef6   : > { %2559 = vadd.xlane.f32.xlu0 %v2558_v46  ;;  %v2530_v49 = vpop.xlane.xlu0 %2529 }
 0xef7   : > { %v2536_v55 = vmul.f32 0.03125, %v2530_v49  ;;  %v2547_v61 = vmul.f32 %v4697_v45, %v4697_v45 }
 0xef9   : > { %v4703_v62 = vsub.f32 %v4673_v25, %v2536_v55  ;;  %v2561_v63 = vsel %vm751_vm3, %v2547_v61, 0.0 }
 0xefa   : > { %2562 = vadd.xlane.f32.xlu1 %v2561_v63 }
 0xefb   : > { %v2548_v1 = vmul.f32 %v4703_v62, %v4703_v62 }
 0xefd   : > { %v2564_v3 = vsel %vm751_vm3, %v2548_v1, 0.0  ;;  %v3757_v1 = vld [vmem:[%s4114_s27 + $0x10] sm:$0xff]  }
 0xefe   : > { %2565 = vadd.xlane.f32.xlu0 %v2564_v3  ;;  %v3759_v3 = vld [vmem:[%s4114_s27] sm:$0xff]  }
 0xf73   : > { %v2551_v6 = vpop.xlane.xlu1 %2550 }
 0xf74   : > { %v2567_v10 = vmul.f32 0.03125, %v2551_v6 }
 0xf76   : > { %v2573_v11 = vadd.f32 1e-05, %v2567_v10 }
 0xf77   : > { %v2554_v12 = vpop.xlane.xlu0 %2553 }
 0xf78   : > { %3868 = vrsqrt.f32 %v2573_v11  ;;  %v2568_v39 = vmul.f32 0.03125, %v2554_v12 }
 0xf7a   : > { %v2574_v5 = vadd.f32 1e-05, %v2568_v39 }
 0xf7b   : > { %v2557_v14 = vpop.xlane.xlu1 %2556 }
 0xf7c   : > { %3870 = vrsqrt.f32 %v2574_v5  ;;  %v2569_v13 = vmul.f32 0.03125, %v2557_v14 }
 0xf7e   : > { %v2575_v15 = vadd.f32 1e-05, %v2569_v13 }
 0xf7f   : > { %v2560_v0 = vpop.xlane.xlu0 %2559 }
 0xf80   : > { %3872 = vrsqrt.f32 %v2575_v15  ;;  %v2570_v7 = vmul.f32 0.03125, %v2560_v0 }
 0xf82   : > { %v2576_v8 = vadd.f32 1e-05, %v2570_v7 }
 0xf83   : > { %v2563_v53 = vpop.xlane.xlu1 %2562 }
 0xf84   : > { %3874 = vrsqrt.f32 %v2576_v8  ;;  %v2571_v20 = vmul.f32 0.03125, %v2563_v53 }
 0xf85   : > { %v3869_v33 = vpop.eup %3868 }
 0xf86   : > { %v2585_v37 = vmul.f32 %v3869_v33, %v2537_v50  ;;  %v2577_v22 = vadd.f32 1e-05, %v2571_v20 }
 0xf87   : > { %v2566_v26 = vpop.xlane.xlu0 %2565 }
 0xf88   : > { %3876 = vrsqrt.f32 %v2577_v22  ;;  %v2572_v41 = vmul.f32 0.03125, %v2566_v26  ;;  %v2595_v57 = vmul.f32 %v2594_v21, %v2585_v37 }
 0xf89   : > { %v3871_v44 = vpop.eup %3870 }
 0xf8a   : > { %v2586_v54 = vmul.f32 %v3871_v44, %v4679_v30  ;;  %v2578_v19 = vadd.f32 1e-05, %v2572_v41  ;;  %v2605_v47 = vadd.f32 %v2604_v27, %v2595_v57 }
 0xf8c   : > { %3878 = vrsqrt.f32 %v2578_v19  ;;  %v2596_v28 = vmul.f32 %v2594_v21, %v2586_v54 }
 0xf8d   : > { %v3873_v31 = vpop.eup %3872 }
 0xf8e   : > { %v2606_v50 = vadd.f32 %v2604_v27, %v2596_v28  ;;  %v2587_v32 = vmul.f32 %v3873_v31, %v4685_v34 }
 0xf90   : > { %v2611_v24 = vpack.c.bf16 %v2606_v50, %v2605_v47  ;;  %v2597_v40 = vmul.f32 %v2594_v21, %v2587_v32 }
 0xf91   : > { %v3875_v36 = vpop.eup %3874 }
 0xf92   : > { %3571 = vmatmul.mubr.msk.bf16.vlgmr.msra.gmra.mxu1 %vm751_vm3, %v2611_v24  ;;  %v2588_v38 = vmul.f32 %v3875_v36, %v4691_v43  ;;  %v2607_v51 = vadd.f32 %v2604_v27, %v2597_v40 }
 0xf93   : > { %3574 = vmatprep.mubr.msk.bf16.mxu1 %vm3962_vm4, %v3961_v18 }
 0xf94   : > { %v2598_v30 = vmul.f32 %v2594_v21, %v2588_v38 }
 0xf95   : > { %v3877_v42 = vpop.eup %3876 }
 0xf96   : > { %v2608_v29 = vadd.f32 %v2604_v27, %v2598_v30  ;;  %v2589_v58 = vmul.f32 %v3877_v42, %v4697_v45  ;;  %v3756_v45 = vld [vmem:[%s4114_s27 + $0x18] sm:$0xff]  }
 0xf97   : > { %3583 = vmatpush3.bf16.msra.mxu0 %v3756_v45 }
 0xf98   : > { %v2612_v59 = vpack.c.bf16 %v2608_v29, %v2607_v51  ;;  %v2599_v43 = vmul.f32 %v2594_v21, %v2589_v58  ;;  %3584 = vmatprep.subr.bf16.mxu0 %v3961_v18 }
 0xf99   : > { %v3879_v34 = vpop.eup %3878 }
 0xf9a   : > { %3575 = vmatmul.mubr.msk.bf16.gmra.mxu1 %vm751_vm3, %v2612_v59  ;;  %v2590_v46 = vmul.f32 %v3879_v34, %v4703_v62  ;;  %v2609_v55 = vadd.f32 %v2604_v27, %v2599_v43  ;;  %v3758_v62 = vld [vmem:[%s4114_s27 + $0x8] sm:$0xff]  }
 0xf9b   : > { %3578 = vmatprep.mubr.msk.bf16.mxu1 %vm3962_vm4, %v3961_v18  ;;  %3585 = vmatpush3.bf16.msra.mxu0 %v3757_v1 }
 0xf9c   : > { %v2600_v49 = vmul.f32 %v2594_v21, %v2590_v46  ;;  %3586 = vmatprep.subr.bf16.mxu0 %v3961_v18 }
 0xf9e   : > { %v2610_v61 = vadd.f32 %v2604_v27, %v2600_v49 }
 0xf9f   : > { %3587 = vmatpush3.bf16.msra.mxu0 %v3758_v62 }
 0xfa0   : > { %v2613_v63 = vpack.c.bf16 %v2610_v61, %v2609_v55  ;;  %3588 = vmatprep.subr.bf16.mxu0 %v3961_v18 }
 0xfa2   : > { %3579 = vmatmul.mubr.msk.bf16.gmra.mxu1 %vm751_vm3, %v2613_v63 }
 0xfa3   : > { %3589 = vmatpush3.bf16.msra.mxu0 %v3759_v3 }
0x1052   : > { %v2680_v4 = vpop.f32.mrf.mxu1 }
0x1053   : > { %v2681_v6 = vadd.f32 %v3252_v56, %v2680_v4 }
0x1054   : > { %v3572_v10 = vpop.f32.mrf.mxu1 }
0x1055   : > { %v2709_v11 = vmul.f32 0.044715, %v2681_v6  ;;  %v2703_v45 = vmul.f32 0.5, %v2681_v6 }
0x1056   : > { %v2683_v12 = vpop.f32.mrf.mxu1 }
0x1057   : > { %v2715_v39 = vmul.f32 %v2709_v11, %v2681_v6  ;;  %v2684_v5 = vadd.f32 %v3252_v56, %v2683_v12 }
0x1058   : > { %v3573_v14 = vpop.f32.mrf.mxu1 }
0x1059   : > { %v2721_v13 = vmul.f32 %v2715_v39, %v2681_v6  ;;  %v2710_v15 = vmul.f32 0.044715, %v2684_v5  ;;  %v2704_v1 = vmul.f32 0.5, %v2684_v5 }
0x105a   : > { %v2688_v0 = vpop.f32.mrf.mxu1 }
0x105b   : > { %v2727_v7 = vadd.f32 %v2721_v13, %v2681_v6  ;;  %v2716_v8 = vmul.f32 %v2710_v15, %v2684_v5  ;;  %v2689_v52 = vadd.f32 %v3252_v56, %v2688_v0 }
0x105c   : > { %v3576_v53 = vpop.f32.mrf.mxu1 }
0x105d   : > { %v2733_v20 = vmul.f32 0.7978846, %v2727_v7  ;;  %v2722_v33 = vmul.f32 %v2716_v8, %v2684_v5  ;;  %v2711_v37 = vmul.f32 0.044715, %v2689_v52  ;;  %v2705_v14 = vmul.f32 0.5, %v2689_v52 }
0x105e   : > { %v2691_v22 = vpop.f32.mrf.mxu1 }
0x105f   : > { %3880 = vtanh.f32 %v2733_v20  ;;  %v2728_v21 = vadd.f32 %v2722_v33, %v2684_v5  ;;  %v2717_v23 = vmul.f32 %v2711_v37, %v2689_v52  ;;  %v2692_v26 = vadd.f32 %v3252_v56, %v2691_v22 }
0x1060   : > { %v3577_v41 = vpop.f32.mrf.mxu1 }
0x1061   : > { %v2734_v44 = vmul.f32 0.7978846, %v2728_v21  ;;  %v2723_v54 = vmul.f32 %v2717_v23, %v2689_v52  ;;  %v2712_v19 = vmul.f32 0.044715, %v2692_v26  ;;  %v2706_v13 = vmul.f32 0.5, %v2692_v26 }
0x1062   : > { %v2696_v57 = vpop.f32.mrf.mxu1 }
0x1063   : > { %3882 = vtanh.f32 %v2734_v44  ;;  %v2729_v27 = vadd.f32 %v2723_v54, %v2689_v52  ;;  %v2718_v28 = vmul.f32 %v2712_v19, %v2692_v26  ;;  %v2697_v31 = vadd.f32 %v3252_v56, %v2696_v57 }
0x1064   : > { %v3580_v47 = vpop.f32.mrf.mxu1  ;;  %v2770_v52 = vsub.s32 5, %v4208_v35 }
0x1065   : > { %v2735_v50 = vmul.f32 0.7978846, %v2729_v27  ;;  %v2724_v32 = vmul.f32 %v2718_v28, %v2692_v26  ;;  %v2713_v24 = vmul.f32 0.044715, %v2697_v31  ;;  %v2707_v20 = vmul.f32 0.5, %v2697_v31 }
0x1066   : > { %v2699_v36 = vpop.f32.mrf.mxu1 }
0x1067   : > { %3884 = vtanh.f32 %v2735_v50  ;;  %v2730_v38 = vadd.f32 %v2724_v32, %v2692_v26  ;;  %v2719_v40 = vmul.f32 %v2713_v24, %v2697_v31  ;;  %v2700_v30 = vadd.f32 %v3252_v56, %v2699_v36 }
0x1068   : > { %v3581_v42 = vpop.f32.mrf.mxu1  ;;  %v2771_v26 = vrot.slane %v4650_v60, %v2770_v52 }
0x1069   : > { %v2736_v51 = vmul.f32 0.7978846, %v2730_v38  ;;  %v2725_v29 = vmul.f32 %v2719_v40, %v2697_v31  ;;  %v2714_v58 = vmul.f32 0.044715, %v2700_v30  ;;  %v2708_v33 = vmul.f32 0.5, %v2700_v30 }
0x106b   : > { %3886 = vtanh.f32 %v2736_v51  ;;  %v2731_v59 = vadd.f32 %v2725_v29, %v2697_v31  ;;  %v2720_v34 = vmul.f32 %v2714_v58, %v2700_v30 }
0x106c   : > { %v3881_v46 = vpop.eup %3880 }
0x106d   : > { %v2737_v43 = vmul.f32 0.7978846, %v2731_v59  ;;  %v2726_v49 = vmul.f32 %v2720_v34, %v2700_v30  ;;  %v2745_v55 = vadd.f32 1.0, %v3881_v46 }
0x106f   : > { %3888 = vtanh.f32 %v2737_v43  ;;  %v2732_v61 = vadd.f32 %v2726_v49, %v2700_v30  ;;  %v2751_v4 = vmul.f32 %v2745_v55, %v2703_v45 }
0x1070   : > { %v3883_v63 = vpop.eup %3882 }
0x1071   : > { %v2746_v62 = vadd.f32 1.0, %v3883_v63  ;;  %v2738_v3 = vmul.f32 0.7978846, %v2732_v61 }
0x1073   : > { %v2752_v56 = vmul.f32 %v2746_v62, %v2704_v1  ;;  %3890 = vtanh.f32 %v2738_v3 }
0x1074   : > { %v3885_v10 = vpop.eup %3884 }
0x1075   : > { %v2757_v11 = vpack.c.bf16 %v2752_v56, %v2751_v4  ;;  %v2747_v12 = vadd.f32 1.0, %v3885_v10 }
0x1077   : > { %3591 = vmatmul.mubr.msk.bf16.vlgmr.msra.gmra.mxu0 %vm2796_vm10, %v2757_v11  ;;  %v2753_v6 = vmul.f32 %v2747_v12, %v2705_v14 }
0x1078   : > { %v3887_v39 = vpop.eup %3886  ;;  %3594 = vmatprep.mubr.msk.bf16.mxu0 %vm3962_vm4, %v3961_v18 }
0x1079   : > { %v2748_v15 = vadd.f32 1.0, %v3887_v39 }
0x107b   : > { %v2754_v5 = vmul.f32 %v2748_v15, %v2706_v13 }
0x107c   : > { %v3889_v0 = vpop.eup %3888 }
0x107d   : > { %v2758_v7 = vpack.c.bf16 %v2754_v5, %v2753_v6  ;;  %v2749_v8 = vadd.f32 1.0, %v3889_v0 }
0x107f   : > { %3595 = vmatmul.mubr.msk.bf16.gmra.mxu0 %vm2796_vm10, %v2758_v7  ;;  %v2755_v22 = vmul.f32 %v2749_v8, %v2707_v20 }
0x1080   : > { %v3891_v53 = vpop.eup %3890  ;;  %3598 = vmatprep.mubr.msk.bf16.mxu0 %vm3962_vm4, %v3961_v18 }
0x1081   : > { %v2750_v37 = vadd.f32 1.0, %v3891_v53 }
0x1083   : > { %v2756_v21 = vmul.f32 %v2750_v37, %v2708_v33 }
0x1085   : > { %v2759_v23 = vpack.c.bf16 %v2756_v21, %v2755_v22 }
0x1087   : > { %3599 = vmatmul.mubr.msk.bf16.gmra.mxu0 %vm2796_vm10, %v2759_v23 }
0x1137   : > { %v2840_v41 = vpop.f32.mrf.mxu0 }
0x1138   : > { %v2841_v44 = vadd.f32 %v2840_v41, %v2771_v26 }
0x1139   : > { %v3592_v54 = vpop.f32.mrf.mxu0 }
0x113a   : > { %v2863_v19 = vadd.f32 %v2841_v44, %v4653_v2 }
0x113b   : > { %v2843_v57 = vpop.f32.mrf.mxu0 }
0x113c   : > { %2869 = vst.msk [vmem:[#allocation2] sm:$0xff] %vm751_vm3, %v2863_v19  ;;  %v2844_v18 = vadd.f32 %v2843_v57, %v2771_v26 }
0x113d   : > { %v3593_v27 = vpop.f32.mrf.mxu0 }
0x113e   : > { %v2864_v28 = vadd.f32 %v2844_v18, %v4657_v9 }
0x113f   : > { %v2848_v31 = vpop.f32.mrf.mxu0 }
0x1140   : > { %2870 = vst.msk [vmem:[#allocation2 + $0x8] sm:$0xff] %vm751_vm3, %v2864_v28  ;;  %v2849_v47 = vadd.f32 %v2848_v31, %v2771_v26 }
0x1141   : > { %v3596_v50 = vpop.f32.mrf.mxu0 }
0x1142   : > { %v2865_v35 = vadd.f32 %v2849_v47, %v4661_v16 }
0x1143   : > { %v2851_v60 = vpop.f32.mrf.mxu0 }
0x1144   : > { %2871 = vst.msk [vmem:[#allocation2 + $0x10] sm:$0xff] %vm751_vm3, %v2865_v35  ;;  %v2852_v32 = vadd.f32 %v2851_v60, %v2771_v26 }
0x1145   : > { %v3597_v24 = vpop.f32.mrf.mxu0 }
0x1146   : > { %v2866_v2 = vadd.f32 %v2852_v32, %v4665_v48 }
0x1147   : > { %v2856_v36 = vpop.f32.mrf.mxu0 }
0x1148   : > { %2872 = vst.msk [vmem:[#allocation2 + $0x18] sm:$0xff] %vm751_vm3, %v2866_v2  ;;  %v2857_v38 = vadd.f32 %v2856_v36, %v2771_v26 }
0x1149   : > { %v3600_v40 = vpop.f32.mrf.mxu0 }
0x114a   : > { %v2867_v9 = vadd.f32 %v2857_v38, %v4669_v17 }
0x114b   : > { %v2859_v30 = vpop.f32.mrf.mxu0 }
0x114c   : > { %2873 = vst.msk [vmem:[#allocation2 + $0x20] sm:$0xff] %vm751_vm3, %v2867_v9  ;;  %v2860_v42 = vadd.f32 %v2859_v30, %v2771_v26  ;;  %2878 = sbr.rel (%p3265_p6) target bundleno = 5156 (0x1424), region = 84 }
0x114d   : > { %v3601_v51 = vpop.f32.mrf.mxu0 }
0x114e   : > { %v2868_v16 = vadd.f32 %v2860_v42, %v4673_v25 }
0x1150   : > { %2874 = vst.msk [vmem:[#allocation2 + $0x28] sm:$0xff] %vm751_vm3, %v2868_v16 }
0x1151   : > { %v2880_v48 = vrot.slane %v2866_v2, 7  ;;  %vm2882_vm11 = vcmask 1040384   ;;  %vm2886_vm12 = vcmask 254976   ;;  %v3899_v25 = vld [vmem:[%s4825_s11 + $0x8] sm:$0xff]   ;;  %v3977_v49 = vmov 0.0   ;;  %v3900_v55 = vld [vmem:[%s4825_s11] sm:$0xff]  }
0x1152   : > { %3602 = vmatprep.subr.bf16.mxu0 %v3977_v49  ;;  %vm3978_vm13 = vmmov 0   ;;  %3610 = vmatprep.subr.bf16.mxu1 %v3977_v49  ;;  %v3266_v62 = vld [vmem:[%s4824_s10] ss:$0 sm:$0xff]  ;;  %v3267_v4 = vld [vmem:[%s4824_s10 + $0x1] ss:$0 sm:$0xff]  ;;  %v3901_v12 = vld [vmem:[%s4826_s12 + $0x8] sm:$0xff]  }
0x1153   : > { %v2883_v29 = vsel %vm2882_vm11, %v2863_v19, %v2880_v48  ;;  %3606 = vmatprep.mubr.msk.bf16.mxu0 %vm3978_vm13, %v3977_v49  ;;  %3603 = vmatpush3.bf16.msra.mxu0 %v3899_v25  ;;  %v3902_v39 = vld [vmem:[%s4826_s12] sm:$0xff]  }
0x1154   : > { %v2887_v58 = vsel %vm2886_vm12, %v2883_v29, 0.0  ;;  %3604 = vmatprep.subr.bf16.mxu0 %v3977_v49  ;;  %3614 = vmatprep.mubr.msk.bf16.mxu1 %vm3978_vm13, %v3977_v49  ;;  %v3268_v14 = vld [vmem:[%s4824_s10 + $0x2] ss:$0 sm:$0xff]  ;;  %v3272_v53 = vld [vmem:[%s4840_s3] ss:$0 sm:$0xff] }
0x1155   : > { %2888 = vadd.xlane.f32.xlu0 %v2887_v58  ;;  %3611 = vmatpush3.bf16.msra.mxu1 %v3901_v12 }
0x1156   : > { %3612 = vmatprep.subr.bf16.mxu1 %v3977_v49 }
0x1157   : > { %3605 = vmatpush3.bf16.msra.mxu0 %v3900_v55 }
0x1159   : > { %3613 = vmatpush3.bf16.msra.mxu1 %v3902_v39 }
0x11de   : > { %v2889_v59 = vpop.xlane.xlu0 %2888 }
0x11df   : > { %v2890_v17 = vmul.f32 0.03125, %v2889_v59 }
0x11e1   : > { %v2891_v34 = vsub.f32 %v2883_v29, %v2890_v17 }
0x11e3   : > { %v2892_v46 = vmul.f32 %v2891_v34, %v2891_v34 }
0x11e5   : > { %v2893_v43 = vsel %vm2886_vm12, %v2892_v46, 0.0 }
0x11e6   : > { %2894 = vadd.xlane.f32.xlu0 %v2893_v43 }
0x126f   : > { %v2895_v61 = vpop.xlane.xlu0 %2894 }
0x1270   : > { %v2896_v63 = vmul.f32 0.03125, %v2895_v61 }
0x1272   : > { %v2897_v45 = vadd.f32 1e-05, %v2896_v63 }
0x1274   : > { %3903 = vrsqrt.f32 %v2897_v45 }
0x1281   : > { %v3904_v1 = vpop.eup %3903 }
0x1282   : > { %v2899_v3 = vmul.f32 %v3904_v1, %v2891_v34 }
0x1284   : > { %v2904_v56 = vmul.f32 %v3266_v62, %v2899_v3 }
0x1286   : > { %v2909_v10 = vadd.f32 %v3267_v4, %v2904_v56 }
0x1288   : > { %v2910_v11 = vpack.c.bf16 %v2909_v10, %v2909_v10 }
0x128a   : > { %3607 = vmatmul.mubr.msk.bf16.vlgmr.msra.gmra.mxu0 %vm751_vm3, %v2910_v11 }
0x134a   : > { %v2969_v13 = vpop.f32.mrf.mxu0 }
0x134b   : > { %v2970_v15 = vadd.f32 %v3268_v14, %v2969_v13 }
0x134c   : > { %v3608_v6 = vpop.f32.mrf.mxu0 }
0x134d   : > { %3905 = vtanh.f32 %v2970_v15 }
0x134e   : > { %v2972_v5 = vpop.f32.mrf.mxu0 }
0x1350   : > { %v3609_v0 = vpop.f32.mrf.mxu0 }
0x135a   : > { %v3906_v7 = vpop.eup %3905 }
0x135b   : > { %v2976_v8 = vpack.c.bf16 %v3906_v7, %v3906_v7 }
0x135d   : > { %3615 = vmatmul.mubr.msk.bf16.vlgmr.msra.gmra.mxu1 %vm751_vm3, %v2976_v8 }
0x141d   : > { %v3037_v20 = vpop.f32.mrf.mxu1 }
0x141e   : > { %v3038_v33 = vadd.f32 %v3272_v53, %v3037_v20 }
0x141f   : > { %v3616_v37 = vpop.f32.mrf.mxu1 }
0x1420   : > { %3043 = vst [vmem:[#allocation3] sm:$0x3] %v3038_v33 }
0x1421   : > { %v3040_v22 = vpop.f32.mrf.mxu1 }
0x1423   : > { %v3617_v21 = vpop.f32.mrf.mxu1 }
0x1424 PF: > { %s4841_s4 = sld [smem:[#allocation7_spill]]  ;;  %s3979_s18 = smov [#allocation3]  }
0x1425   : > { %s3053_s21 = sshll.u32 %s3979_s18, 4  ;;  %s3054_s21 = int_to_ptr.vmem [resolvable:$true] %s3053_s21 }
0x1426   : > { %s3907_s29 = scalar_lea.vmem %s3054_s21, 32  ;;  %p3914_p11 = scmp.lt.s32.totalorder %s3054_s21, %s3054_s21 }
0x1427   : > { %p3908_p8 = scmp.ne.s32.totalorder %s3054_s21, %s3907_s29  ;;  %p3915_p12 = scmp.lt.s32.totalorder %s3907_s29, %s3907_s29 }
0x1429   : > { %p3916_p13 = por %p3915_p12, %p3914_p11 }
0x142a   : > { %s4842_s14 = sadd.s32 4294967295, %s4841_s4  }
0x142b   : > { %p4790_p7 = scmp.eq.s32.totalorder %s4842_s14, 1 }
0x142d   : > { %p3909_p9 = pnand %p3908_p8, %p4790_p7 }
0x142f   : > { %p3910_p10 = pneg %p3909_p9 }
0x1431   : > { %p3917_p0 = pnand %p3916_p13, %p3910_p10 }
0x1433   : > { %3920 = shalt.err (!%p3917_p0)
}
0x1434   : > { %s4844_s16 = sld [smem:[#allocation12_spill]] }
0x143a   : > { %3651 = dma.vmem_to_hbm [thread:$0]  (%p4790_p7), %s3054_s21, 32, %s4844_s16, [#allocation4]  }
0x143b   : > { %3944 = dma.done.wait (%p4790_p7), [#allocation4], 32  }
0x143c   : > { %3946 = vsyncadd (%p4790_p7), [#allocation4], 4294967264 }
0x143d PF: > { %s4845_s20 = sld [smem:[#allocation7_spill]] }
0x143e   : > { %s4846_s29 = sld [smem:[#allocation6_spill]] }
0x143f   : > { %s4847_s30 = sld [smem:[#allocation8_spill]] }
0x1443   : > { %s25_s15 = sadd.s32 1, %s4845_s20  }
0x1444   : > { %p22_p1 = scmp.ge.s32.totalorder %s25_s15, 4  }
0x1446   :  { %24 = sbr.rel (!%p22_p1) target bundleno = 7 (0x7), region = 133 }
0x144b   :  { %3066 = vsyncpa [#allocation4], 1 }
0x144c   :  { %3068 = vsyncpa [#allocation4 + $0x1], 1 }

</bundles_post_ra>
